<compile_context>
chip_gen: v6e
topology: v6e:2x2x1
jax: 0.10.0
libtpu: 0.0.40
codegen_flags: <defaults>
</compile_context>

<pallas_src>
import functools

import jax
import jax.numpy as jnp
import numpy as np
from jax.experimental import pallas as pl
from jax.experimental.pallas import tpu as pltpu  # noqa: F401  (TPU backend knobs if needed)

INPUT_SIZE = 3
HIDDEN = 32
NUM_LAYERS = 2
BATCH = 2
SEQ = 8


def _round_up8(n):
    return ((n + 7) // 8) * 8


# ---- packed weight-slab layout (rows x 128 lanes), all starts 8-aligned ----
ROW_WIH0 = 0                                   # (D, 4H)   = W_ih0^T
ROW_B0 = _round_up8(ROW_WIH0 + INPUT_SIZE)     # (1, 4H)   = b_ih0 + b_hh0
ROW_WHH0 = _round_up8(ROW_B0 + 1)              # (H, 4H)   = W_hh0^T
ROW_WIH1 = _round_up8(ROW_WHH0 + HIDDEN)       # (H, 4H)   = W_ih1^T
ROW_WHH1 = _round_up8(ROW_WIH1 + HIDDEN)       # (H, 4H)   = W_hh1^T
ROW_B1 = _round_up8(ROW_WHH1 + HIDDEN)         # (1, 4H)   = b_ih1 + b_hh1
ROW_WHEAD = _round_up8(ROW_B1 + 1)             # (H, 128)  lanes 0/1 = reg/cls
ROW_BHEAD = _round_up8(ROW_WHEAD + HIDDEN)     # (1, 128)  lanes 0/1 = reg/cls
SLAB_ROWS = _round_up8(ROW_BHEAD + 1)          # 160 rows total (80 KiB)


def _lstm_kernel(x_ref, w_ref, out_ref, *, hidden, batch, seq, input_size):
    H, B, T, D = hidden, batch, seq, input_size
    G = 4 * H

    # ---- carve packed slab with static, 8-aligned row slices (cheap loads) ----
    wih0 = w_ref[ROW_WIH0:ROW_WIH0 + D, :]              # (D, 4H)
    b0 = w_ref[ROW_B0:ROW_B0 + 1, :]                    # (1, 4H)
    whh0 = w_ref[ROW_WHH0:ROW_WHH0 + H, :]              # (H, 4H)
    wih1 = w_ref[ROW_WIH1:ROW_WIH1 + H, :]              # (H, 4H)
    whh1 = w_ref[ROW_WHH1:ROW_WHH1 + H, :]              # (H, 4H)
    b1 = jnp.broadcast_to(w_ref[ROW_B1:ROW_B1 + 1, :], (B, G))   # hoisted broadcast
    whead = w_ref[ROW_WHEAD:ROW_WHEAD + H, :]            # (H, 128)
    bhead = w_ref[ROW_BHEAD:ROW_BHEAD + 1, :]            # (1, 128)

    # ---- hoisted layer-0 input projection: one matmul for all timesteps ----
    # x_ref is batch-major rows: row b*T + t == x[b, t, :].
    xp = jnp.dot(x_ref[...], wih0, preferred_element_type=jnp.float32) + b0   # (B*T, 4H)
    xp = xp.reshape(B, T, G)                              # 8-aligned sublane split
    # Per-timestep slabs depend only on inputs -> materialize before the
    # recurrence so they stay off the serial critical path.
    xp_t = [xp[:, t, :] for t in range(T)]

    # Lane-band mask for the tanh'd "g" gate (PyTorch gate order i, f, g, o).
    lane = jax.lax.broadcasted_iota(jnp.int32, (B, G), 1)
    g_band = (lane >= 2 * H) & (lane < 3 * H)

    def cell(gates, c_prev):
        # Fused activations: 1 sigmoid + 1 tanh over the full (B, 4H) row,
        # then select -> 3 EUP pushes per cell (incl. tanh(c_new)) instead of 5.
        sig = jax.nn.sigmoid(gates)
        th = jnp.tanh(gates)
        act = jnp.where(g_band, th, sig)                  # [i, f, g, o] activated
        i_g = act[:, 0 * H:1 * H]
        f_g = act[:, 1 * H:2 * H]
        g_g = act[:, 2 * H:3 * H]
        o_g = act[:, 3 * H:4 * H]
        c_new = f_g * c_prev + i_g * g_g
        h_new = o_g * jnp.tanh(c_new)
        return h_new, c_new

    # Recurrent state carried as plain values (registers) across the unrolled loop.
    h0 = jnp.zeros((B, H), jnp.float32)
    c0 = jnp.zeros((B, H), jnp.float32)
    h1 = jnp.zeros((B, H), jnp.float32)
    c1 = jnp.zeros((B, H), jnp.float32)

    for t in range(T):  # T is static (=8) -> fully unrolled
        # Layer 0: x-projection precomputed; only the recurrent dot is serial.
        g0 = xp_t[t] + jnp.dot(h0, whh0, preferred_element_type=jnp.float32)
        h0, c0 = cell(g0, c0)

        # Layer 1: two independent MXU dots (no lane concat on the serial path).
        g1 = (jnp.dot(h0, wih1, preferred_element_type=jnp.float32)
              + jnp.dot(h1, whh1, preferred_element_type=jnp.float32)
              + b1)
        h1, c1 = cell(g1, c1)

    # Lane-dense fused heads: lane 0 = regressor (linear), lane 1 = sigmoid
    # classifier, lanes 2..127 are zero padding (discarded in the wrapper).
    heads = jnp.dot(h1, whead, preferred_element_type=jnp.float32) + bhead    # (B, 128)
    col = jax.lax.broadcasted_iota(jnp.int32, heads.shape, 1)
    out_ref[...] = jnp.where(col == 1, jax.nn.sigmoid(heads), heads)


def dual_head_lstm(x, w_slab):
    """x: (B, T, D) float32.  Returns (price (B,1), direction (B,1))."""
    B, T, D = x.shape
    # Contiguous batch-major flatten (no transpose) -> free metadata reshape.
    x2d = x.reshape(B * T, D)

    kernel = functools.partial(_lstm_kernel, hidden=HIDDEN, batch=B, seq=T,
                               input_size=D)
    out = pl.pallas_call(
        kernel,
        out_shape=jax.ShapeDtypeStruct((B, 4 * HIDDEN), jnp.float32),
        # No grid / BlockSpecs: single invocation, 2 input DMAs (x + weight
        # slab), everything resident in VMEM (<100 KiB).
    )(x2d, w_slab)

    return out[:, 0:1], out[:, 1:2]


def init_params(key, input_size=INPUT_SIZE, hidden=HIDDEN):
    """Deterministic PyTorch-style uniform(-1/sqrt(H), 1/sqrt(H)) init."""
    bound = 1.0 / np.sqrt(hidden)
    ks = jax.random.split(key, 12)
    u = lambda k, shape: jax.random.uniform(k, shape, jnp.float32, -bound, bound)

    # Layer 0
    w_ih0 = u(ks[0], (4 * hidden, input_size))
    w_hh0 = u(ks[1], (4 * hidden, hidden))
    b_ih0 = u(ks[2], (4 * hidden,))
    b_hh0 = u(ks[3], (4 * hidden,))
    # Layer 1
    w_ih1 = u(ks[4], (4 * hidden, hidden))
    w_hh1 = u(ks[5], (4 * hidden, hidden))
    b_ih1 = u(ks[6], (4 * hidden,))
    b_hh1 = u(ks[7], (4 * hidden,))
    # Heads (nn.Linear(hidden, 1) x2)
    w_reg = u(ks[8], (1, hidden))
    b_reg = u(ks[9], (1,))
    w_cls = u(ks[10], (1, hidden))
    b_cls = u(ks[11], (1,))

    raw = dict(w_ih0=w_ih0, w_hh0=w_hh0, b_ih0=b_ih0, b_hh0=b_hh0,
               w_ih1=w_ih1, w_hh1=w_hh1, b_ih1=b_ih1, b_hh1=b_hh1,
               w_reg=w_reg, b_reg=b_reg, w_cls=w_cls, b_cls=b_cls)

    # Pack everything into one (SLAB_ROWS, 4H) f32 slab -> single DMA.
    G = 4 * hidden
    slab = jnp.zeros((SLAB_ROWS, G), jnp.float32)
    slab = slab.at[ROW_WIH0:ROW_WIH0 + input_size, :].set(w_ih0.T)
    slab = slab.at[ROW_B0, :].set(b_ih0 + b_hh0)
    slab = slab.at[ROW_WHH0:ROW_WHH0 + hidden, :].set(w_hh0.T)
    slab = slab.at[ROW_WIH1:ROW_WIH1 + hidden, :].set(w_ih1.T)
    slab = slab.at[ROW_WHH1:ROW_WHH1 + hidden, :].set(w_hh1.T)
    slab = slab.at[ROW_B1, :].set(b_ih1 + b_hh1)
    whead = jnp.concatenate([w_reg, w_cls], axis=0).T            # (H, 2)
    bhead = jnp.concatenate([b_reg, b_cls], axis=0)              # (2,)
    slab = slab.at[ROW_WHEAD:ROW_WHEAD + hidden, 0:2].set(whead)
    slab = slab.at[ROW_BHEAD, 0:2].set(bhead)

    return raw, slab


def reference_forward(x, raw):
    """Pure-JAX reference matching torch.nn.LSTM semantics (gate order i,f,g,o)."""
    B, T, _ = x.shape
    H = HIDDEN

    def layer(inp, w_ih, w_hh, b_ih, b_hh):
        h = jnp.zeros((B, H), jnp.float32)
        c = jnp.zeros((B, H), jnp.float32)
        outs = []
        for t in range(T):
            g = inp[:, t, :] @ w_ih.T + b_ih + h @ w_hh.T + b_hh
            i = jax.nn.sigmoid(g[:, 0 * H:1 * H])
            f = jax.nn.sigmoid(g[:, 1 * H:2 * H])
            gg = jnp.tanh(g[:, 2 * H:3 * H])
            o = jax.nn.sigmoid(g[:, 3 * H:4 * H])
            c = f * c + i * gg
            h = o * jnp.tanh(c)
            outs.append(h)
        return jnp.stack(outs, axis=1)

    out0 = layer(x, raw["w_ih0"], raw["w_hh0"], raw["b_ih0"], raw["b_hh0"])
    out1 = layer(out0, raw["w_ih1"], raw["w_hh1"], raw["b_ih1"], raw["b_hh1"])
    last = out1[:, -1, :]
    price = last @ raw["w_reg"].T + raw["b_reg"]
    direction = jax.nn.sigmoid(last @ raw["w_cls"].T + raw["b_cls"])
    return price, direction


if __name__ == "__main__":
    key = jax.random.PRNGKey(0)
    kx, kp = jax.random.split(key)
    x = jax.random.normal(kx, (BATCH, SEQ, INPUT_SIZE), jnp.float32)
    raw, w_slab = init_params(kp)

    price, direction = dual_head_lstm(x, w_slab)
    jax.block_until_ready((price, direction))

    price_ref, dir_ref = reference_forward(x, raw)
    np.testing.assert_allclose(np.asarray(price), np.asarray(price_ref),
                               rtol=1e-5, atol=1e-5)
    np.testing.assert_allclose(np.asarray(direction), np.asarray(dir_ref),
                               rtol=1e-5, atol=1e-5)
    # TODO(synk): for real throughput / v7x dual-TC use, batch many sequences
    # into the matmul M dimension and add a "parallel" grid axis over them.
    print("KERNEL_OK")
</pallas_src>

<mosaic_0001>
module attributes {stable_mosaic.version = 11 : i64} {
  func.func @_lstm_kernel(%arg0: memref<16x3xf32, #tpu.memory_space<vmem>>, %arg1: memref<160x128xf32, #tpu.memory_space<vmem>>, %arg2: memref<2x128xf32, #tpu.memory_space<vmem>>) attributes {dimension_semantics = [], scalar_prefetch = 0 : i64, scratch_operands = 0 : i64, tpu.core_type = #tpu.core_type<tc>} {
    %c0 = arith.constant 0 : index
    %c0_0 = arith.constant 0 : index
    %0 = vector.load %arg1[%c0, %c0_0] : memref<160x128xf32, #tpu.memory_space<vmem>>, vector<3x128xf32>
    %c8 = arith.constant 8 : index
    %c0_1 = arith.constant 0 : index
    %1 = vector.load %arg1[%c8, %c0_1] : memref<160x128xf32, #tpu.memory_space<vmem>>, vector<1x128xf32>
    %c16 = arith.constant 16 : index
    %c0_2 = arith.constant 0 : index
    %2 = vector.load %arg1[%c16, %c0_2] : memref<160x128xf32, #tpu.memory_space<vmem>>, vector<32x128xf32>
    %c48 = arith.constant 48 : index
    %c0_3 = arith.constant 0 : index
    %3 = vector.load %arg1[%c48, %c0_3] : memref<160x128xf32, #tpu.memory_space<vmem>>, vector<32x128xf32>
    %c80 = arith.constant 80 : index
    %c0_4 = arith.constant 0 : index
    %4 = vector.load %arg1[%c80, %c0_4] : memref<160x128xf32, #tpu.memory_space<vmem>>, vector<32x128xf32>
    %c112 = arith.constant 112 : index
    %c0_5 = arith.constant 0 : index
    %5 = vector.load %arg1[%c112, %c0_5] : memref<160x128xf32, #tpu.memory_space<vmem>>, vector<1x128xf32>
    %6 = vector.shape_cast %5 : vector<1x128xf32> to vector<1x128xf32>
    %7 = vector.broadcast %6 : vector<1x128xf32> to vector<2x128xf32>
    %c120 = arith.constant 120 : index
    %c0_6 = arith.constant 0 : index
    %8 = vector.load %arg1[%c120, %c0_6] : memref<160x128xf32, #tpu.memory_space<vmem>>, vector<32x128xf32>
    %c152 = arith.constant 152 : index
    %c0_7 = arith.constant 0 : index
    %9 = vector.load %arg1[%c152, %c0_7] : memref<160x128xf32, #tpu.memory_space<vmem>>, vector<1x128xf32>
    %c0_8 = arith.constant 0 : index
    %c0_9 = arith.constant 0 : index
    %10 = vector.load %arg0[%c0_8, %c0_9] : memref<16x3xf32, #tpu.memory_space<vmem>>, vector<16x3xf32>
    %cst = arith.constant dense<0.000000e+00> : vector<16x128xf32>
    %11 = tpu.matmul %10, %0, %cst {dimension_numbers = #tpu.dot_dimension_numbers<[1], [0], [0], [1], [0, 0, 1, 1], [], []>} : vector<16x3xf32>, vector<3x128xf32>, vector<16x128xf32> -> vector<16x128xf32>
    %12 = vector.broadcast %1 : vector<1x128xf32> to vector<16x128xf32>
    %13 = arith.addf %11, %12 : vector<16x128xf32>
    %14 = vector.shape_cast %13 : vector<16x128xf32> to vector<2x8x128xf32>
    %15 = vector.extract_strided_slice %14 {offsets = [0, 0, 0], sizes = [2, 1, 128], strides = [1, 1, 1]} : vector<2x8x128xf32> to vector<2x1x128xf32>
    %16 = vector.shape_cast %15 : vector<2x1x128xf32> to vector<2x128xf32>
    %17 = vector.extract_strided_slice %14 {offsets = [0, 1, 0], sizes = [2, 1, 128], strides = [1, 1, 1]} : vector<2x8x128xf32> to vector<2x1x128xf32>
    %18 = vector.shape_cast %17 : vector<2x1x128xf32> to vector<2x128xf32>
    %19 = vector.extract_strided_slice %14 {offsets = [0, 2, 0], sizes = [2, 1, 128], strides = [1, 1, 1]} : vector<2x8x128xf32> to vector<2x1x128xf32>
    %20 = vector.shape_cast %19 : vector<2x1x128xf32> to vector<2x128xf32>
    %21 = vector.extract_strided_slice %14 {offsets = [0, 3, 0], sizes = [2, 1, 128], strides = [1, 1, 1]} : vector<2x8x128xf32> to vector<2x1x128xf32>
    %22 = vector.shape_cast %21 : vector<2x1x128xf32> to vector<2x128xf32>
    %23 = vector.extract_strided_slice %14 {offsets = [0, 4, 0], sizes = [2, 1, 128], strides = [1, 1, 1]} : vector<2x8x128xf32> to vector<2x1x128xf32>
    %24 = vector.shape_cast %23 : vector<2x1x128xf32> to vector<2x128xf32>
    %25 = vector.extract_strided_slice %14 {offsets = [0, 5, 0], sizes = [2, 1, 128], strides = [1, 1, 1]} : vector<2x8x128xf32> to vector<2x1x128xf32>
    %26 = vector.shape_cast %25 : vector<2x1x128xf32> to vector<2x128xf32>
    %27 = vector.extract_strided_slice %14 {offsets = [0, 6, 0], sizes = [2, 1, 128], strides = [1, 1, 1]} : vector<2x8x128xf32> to vector<2x1x128xf32>
    %28 = vector.shape_cast %27 : vector<2x1x128xf32> to vector<2x128xf32>
    %29 = vector.extract_strided_slice %14 {offsets = [0, 7, 0], sizes = [2, 1, 128], strides = [1, 1, 1]} : vector<2x8x128xf32> to vector<2x1x128xf32>
    %30 = vector.shape_cast %29 : vector<2x1x128xf32> to vector<2x128xf32>
    %31 = tpu.iota {dimensions = array<i32: 1>} : vector<2x128xi32>
    %c64_i32 = arith.constant 64 : i32
    %32 = vector.broadcast %c64_i32 : i32 to vector<2x128xi32>
    %33 = arith.cmpi sge, %31, %32 : vector<2x128xi32>
    %c96_i32 = arith.constant 96 : i32
    %34 = vector.broadcast %c96_i32 : i32 to vector<2x128xi32>
    %35 = arith.cmpi slt, %31, %34 : vector<2x128xi32>
    %36 = arith.andi %33, %35 : vector<2x128xi1>
    %cst_10 = arith.constant 0.000000e+00 : f32
    %37 = vector.broadcast %cst_10 : f32 to vector<2x32xf32>
    %cst_11 = arith.constant 0.000000e+00 : f32
    %38 = vector.broadcast %cst_11 : f32 to vector<2x32xf32>
    %cst_12 = arith.constant 0.000000e+00 : f32
    %39 = vector.broadcast %cst_12 : f32 to vector<2x32xf32>
    %cst_13 = arith.constant 0.000000e+00 : f32
    %40 = vector.broadcast %cst_13 : f32 to vector<2x32xf32>
    %cst_14 = arith.constant dense<0.000000e+00> : vector<2x128xf32>
    %41 = tpu.matmul %37, %2, %cst_14 {dimension_numbers = #tpu.dot_dimension_numbers<[1], [0], [0], [1], [0, 0, 1, 1], [], []>} : vector<2x32xf32>, vector<32x128xf32>, vector<2x128xf32> -> vector<2x128xf32>
    %42 = arith.addf %16, %41 : vector<2x128xf32>
    %43 = arith.negf %42 : vector<2x128xf32>
    %44 = math.exp %43 : vector<2x128xf32>
    %cst_15 = arith.constant 1.000000e+00 : f32
    %45 = vector.broadcast %cst_15 : f32 to vector<2x128xf32>
    %46 = arith.addf %45, %44 : vector<2x128xf32>
    %47 = arith.divf %45, %46 : vector<2x128xf32>
    %48 = math.tanh %42 : vector<2x128xf32>
    %49 = arith.select %36, %48, %47 : vector<2x128xi1>, vector<2x128xf32>
    %50 = vector.extract_strided_slice %49 {offsets = [0, 0], sizes = [2, 32], strides = [1, 1]} : vector<2x128xf32> to vector<2x32xf32>
    %51 = vector.extract_strided_slice %49 {offsets = [0, 32], sizes = [2, 32], strides = [1, 1]} : vector<2x128xf32> to vector<2x32xf32>
    %52 = vector.extract_strided_slice %49 {offsets = [0, 64], sizes = [2, 32], strides = [1, 1]} : vector<2x128xf32> to vector<2x32xf32>
    %53 = vector.extract_strided_slice %49 {offsets = [0, 96], sizes = [2, 32], strides = [1, 1]} : vector<2x128xf32> to vector<2x32xf32>
    %54 = arith.mulf %51, %38 : vector<2x32xf32>
    %55 = arith.mulf %50, %52 : vector<2x32xf32>
    %56 = arith.addf %54, %55 : vector<2x32xf32>
    %57 = math.tanh %56 : vector<2x32xf32>
    %58 = arith.mulf %53, %57 : vector<2x32xf32>
    %cst_16 = arith.constant dense<0.000000e+00> : vector<2x128xf32>
    %59 = tpu.matmul %58, %3, %cst_16 {dimension_numbers = #tpu.dot_dimension_numbers<[1], [0], [0], [1], [0, 0, 1, 1], [], []>} : vector<2x32xf32>, vector<32x128xf32>, vector<2x128xf32> -> vector<2x128xf32>
    %cst_17 = arith.constant dense<0.000000e+00> : vector<2x128xf32>
    %60 = tpu.matmul %39, %4, %cst_17 {dimension_numbers = #tpu.dot_dimension_numbers<[1], [0], [0], [1], [0, 0, 1, 1], [], []>} : vector<2x32xf32>, vector<32x128xf32>, vector<2x128xf32> -> vector<2x128xf32>
    %61 = arith.addf %59, %60 : vector<2x128xf32>
    %62 = arith.addf %61, %7 : vector<2x128xf32>
    %63 = arith.negf %62 : vector<2x128xf32>
    %64 = math.exp %63 : vector<2x128xf32>
    %cst_18 = arith.constant 1.000000e+00 : f32
    %65 = vector.broadcast %cst_18 : f32 to vector<2x128xf32>
    %66 = arith.addf %65, %64 : vector<2x128xf32>
    %67 = arith.divf %65, %66 : vector<2x128xf32>
    %68 = math.tanh %62 : vector<2x128xf32>
    %69 = arith.select %36, %68, %67 : vector<2x128xi1>, vector<2x128xf32>
    %70 = vector.extract_strided_slice %69 {offsets = [0, 0], sizes = [2, 32], strides = [1, 1]} : vector<2x128xf32> to vector<2x32xf32>
    %71 = vector.extract_strided_slice %69 {offsets = [0, 32], sizes = [2, 32], strides = [1, 1]} : vector<2x128xf32> to vector<2x32xf32>
    %72 = vector.extract_strided_slice %69 {offsets = [0, 64], sizes = [2, 32], strides = [1, 1]} : vector<2x128xf32> to vector<2x32xf32>
    %73 = vector.extract_strided_slice %69 {offsets = [0, 96], sizes = [2, 32], strides = [1, 1]} : vector<2x128xf32> to vector<2x32xf32>
    %74 = arith.mulf %71, %40 : vector<2x32xf32>
    %75 = arith.mulf %70, %72 : vector<2x32xf32>
    %76 = arith.addf %74, %75 : vector<2x32xf32>
    %77 = math.tanh %76 : vector<2x32xf32>
    %78 = arith.mulf %73, %77 : vector<2x32xf32>
    %cst_19 = arith.constant dense<0.000000e+00> : vector<2x128xf32>
    %79 = tpu.matmul %58, %2, %cst_19 {dimension_numbers = #tpu.dot_dimension_numbers<[1], [0], [0], [1], [0, 0, 1, 1], [], []>} : vector<2x32xf32>, vector<32x128xf32>, vector<2x128xf32> -> vector<2x128xf32>
    %80 = arith.addf %18, %79 : vector<2x128xf32>
    %81 = arith.negf %80 : vector<2x128xf32>
    %82 = math.exp %81 : vector<2x128xf32>
    %cst_20 = arith.constant 1.000000e+00 : f32
    %83 = vector.broadcast %cst_20 : f32 to vector<2x128xf32>
    %84 = arith.addf %83, %82 : vector<2x128xf32>
    %85 = arith.divf %83, %84 : vector<2x128xf32>
    %86 = math.tanh %80 : vector<2x128xf32>
    %87 = arith.select %36, %86, %85 : vector<2x128xi1>, vector<2x128xf32>
    %88 = vector.extract_strided_slice %87 {offsets = [0, 0], sizes = [2, 32], strides = [1, 1]} : vector<2x128xf32> to vector<2x32xf32>
    %89 = vector.extract_strided_slice %87 {offsets = [0, 32], sizes = [2, 32], strides = [1, 1]} : vector<2x128xf32> to vector<2x32xf32>
    %90 = vector.extract_strided_slice %87 {offsets = [0, 64], sizes = [2, 32], strides = [1, 1]} : vector<2x128xf32> to vector<2x32xf32>
    %91 = vector.extract_strided_slice %87 {offsets = [0, 96], sizes = [2, 32], strides = [1, 1]} : vector<2x128xf32> to vector<2x32xf32>
    %92 = arith.mulf %89, %56 : vector<2x32xf32>
    %93 = arith.mulf %88, %90 : vector<2x32xf32>
    %94 = arith.addf %92, %93 : vector<2x32xf32>
    %95 = math.tanh %94 : vector<2x32xf32>
    %96 = arith.mulf %91, %95 : vector<2x32xf32>
    %cst_21 = arith.constant dense<0.000000e+00> : vector<2x128xf32>
    %97 = tpu.matmul %96, %3, %cst_21 {dimension_numbers = #tpu.dot_dimension_numbers<[1], [0], [0], [1], [0, 0, 1, 1], [], []>} : vector<2x32xf32>, vector<32x128xf32>, vector<2x128xf32> -> vector<2x128xf32>
    %cst_22 = arith.constant dense<0.000000e+00> : vector<2x128xf32>
    %98 = tpu.matmul %78, %4, %cst_22 {dimension_numbers = #tpu.dot_dimension_numbers<[1], [0], [0], [1], [0, 0, 1, 1], [], []>} : vector<2x32xf32>, vector<32x128xf32>, vector<2x128xf32> -> vector<2x128xf32>
    %99 = arith.addf %97, %98 : vector<2x128xf32>
    %100 = arith.addf %99, %7 : vector<2x128xf32>
    %101 = arith.negf %100 : vector<2x128xf32>
    %102 = math.exp %101 : vector<2x128xf32>
    %cst_23 = arith.constant 1.000000e+00 : f32
    %103 = vector.broadcast %cst_23 : f32 to vector<2x128xf32>
    %104 = arith.addf %103, %102 : vector<2x128xf32>
    %105 = arith.divf %103, %104 : vector<2x128xf32>
    %106 = math.tanh %100 : vector<2x128xf32>
    %107 = arith.select %36, %106, %105 : vector<2x128xi1>, vector<2x128xf32>
    %108 = vector.extract_strided_slice %107 {offsets = [0, 0], sizes = [2, 32], strides = [1, 1]} : vector<2x128xf32> to vector<2x32xf32>
    %109 = vector.extract_strided_slice %107 {offsets = [0, 32], sizes = [2, 32], strides = [1, 1]} : vector<2x128xf32> to vector<2x32xf32>
    %110 = vector.extract_strided_slice %107 {offsets = [0, 64], sizes = [2, 32], strides = [1, 1]} : vector<2x128xf32> to vector<2x32xf32>
    %111 = vector.extract_strided_slice %107 {offsets = [0, 96], sizes = [2, 32], strides = [1, 1]} : vector<2x128xf32> to vector<2x32xf32>
    %112 = arith.mulf %109, %76 : vector<2x32xf32>
    %113 = arith.mulf %108, %110 : vector<2x32xf32>
    %114 = arith.addf %112, %113 : vector<2x32xf32>
    %115 = math.tanh %114 : vector<2x32xf32>
    %116 = arith.mulf %111, %115 : vector<2x32xf32>
    %cst_24 = arith.constant dense<0.000000e+00> : vector<2x128xf32>
    %117 = tpu.matmul %96, %2, %cst_24 {dimension_numbers = #tpu.dot_dimension_numbers<[1], [0], [0], [1], [0, 0, 1, 1], [], []>} : vector<2x32xf32>, vector<32x128xf32>, vector<2x128xf32> -> vector<2x128xf32>
    %118 = arith.addf %20, %117 : vector<2x128xf32>
    %119 = arith.negf %118 : vector<2x128xf32>
    %120 = math.exp %119 : vector<2x128xf32>
    %cst_25 = arith.constant 1.000000e+00 : f32
    %121 = vector.broadcast %cst_25 : f32 to vector<2x128xf32>
    %122 = arith.addf %121, %120 : vector<2x128xf32>
    %123 = arith.divf %121, %122 : vector<2x128xf32>
    %124 = math.tanh %118 : vector<2x128xf32>
    %125 = arith.select %36, %124, %123 : vector<2x128xi1>, vector<2x128xf32>
    %126 = vector.extract_strided_slice %125 {offsets = [0, 0], sizes = [2, 32], strides = [1, 1]} : vector<2x128xf32> to vector<2x32xf32>
    %127 = vector.extract_strided_slice %125 {offsets = [0, 32], sizes = [2, 32], strides = [1, 1]} : vector<2x128xf32> to vector<2x32xf32>
    %128 = vector.extract_strided_slice %125 {offsets = [0, 64], sizes = [2, 32], strides = [1, 1]} : vector<2x128xf32> to vector<2x32xf32>
    %129 = vector.extract_strided_slice %125 {offsets = [0, 96], sizes = [2, 32], strides = [1, 1]} : vector<2x128xf32> to vector<2x32xf32>
    %130 = arith.mulf %127, %94 : vector<2x32xf32>
    %131 = arith.mulf %126, %128 : vector<2x32xf32>
    %132 = arith.addf %130, %131 : vector<2x32xf32>
    %133 = math.tanh %132 : vector<2x32xf32>
    %134 = arith.mulf %129, %133 : vector<2x32xf32>
    %cst_26 = arith.constant dense<0.000000e+00> : vector<2x128xf32>
    %135 = tpu.matmul %134, %3, %cst_26 {dimension_numbers = #tpu.dot_dimension_numbers<[1], [0], [0], [1], [0, 0, 1, 1], [], []>} : vector<2x32xf32>, vector<32x128xf32>, vector<2x128xf32> -> vector<2x128xf32>
    %cst_27 = arith.constant dense<0.000000e+00> : vector<2x128xf32>
    %136 = tpu.matmul %116, %4, %cst_27 {dimension_numbers = #tpu.dot_dimension_numbers<[1], [0], [0], [1], [0, 0, 1, 1], [], []>} : vector<2x32xf32>, vector<32x128xf32>, vector<2x128xf32> -> vector<2x128xf32>
    %137 = arith.addf %135, %136 : vector<2x128xf32>
    %138 = arith.addf %137, %7 : vector<2x128xf32>
    %139 = arith.negf %138 : vector<2x128xf32>
    %140 = math.exp %139 : vector<2x128xf32>
    %cst_28 = arith.constant 1.000000e+00 : f32
    %141 = vector.broadcast %cst_28 : f32 to vector<2x128xf32>
    %142 = arith.addf %141, %140 : vector<2x128xf32>
    %143 = arith.divf %141, %142 : vector<2x128xf32>
    %144 = math.tanh %138 : vector<2x128xf32>
    %145 = arith.select %36, %144, %143 : vector<2x128xi1>, vector<2x128xf32>
    %146 = vector.extract_strided_slice %145 {offsets = [0, 0], sizes = [2, 32], strides = [1, 1]} : vector<2x128xf32> to vector<2x32xf32>
    %147 = vector.extract_strided_slice %145 {offsets = [0, 32], sizes = [2, 32], strides = [1, 1]} : vector<2x128xf32> to vector<2x32xf32>
    %148 = vector.extract_strided_slice %145 {offsets = [0, 64], sizes = [2, 32], strides = [1, 1]} : vector<2x128xf32> to vector<2x32xf32>
    %149 = vector.extract_strided_slice %145 {offsets = [0, 96], sizes = [2, 32], strides = [1, 1]} : vector<2x128xf32> to vector<2x32xf32>
    %150 = arith.mulf %147, %114 : vector<2x32xf32>
    %151 = arith.mulf %146, %148 : vector<2x32xf32>
    %152 = arith.addf %150, %151 : vector<2x32xf32>
    %153 = math.tanh %152 : vector<2x32xf32>
    %154 = arith.mulf %149, %153 : vector<2x32xf32>
    %cst_29 = arith.constant dense<0.000000e+00> : vector<2x128xf32>
    %155 = tpu.matmul %134, %2, %cst_29 {dimension_numbers = #tpu.dot_dimension_numbers<[1], [0], [0], [1], [0, 0, 1, 1], [], []>} : vector<2x32xf32>, vector<32x128xf32>, vector<2x128xf32> -> vector<2x128xf32>
    %156 = arith.addf %22, %155 : vector<2x128xf32>
    %157 = arith.negf %156 : vector<2x128xf32>
    %158 = math.exp %157 : vector<2x128xf32>
    %cst_30 = arith.constant 1.000000e+00 : f32
    %159 = vector.broadcast %cst_30 : f32 to vector<2x128xf32>
    %160 = arith.addf %159, %158 : vector<2x128xf32>
    %161 = arith.divf %159, %160 : vector<2x128xf32>
    %162 = math.tanh %156 : vector<2x128xf32>
    %163 = arith.select %36, %162, %161 : vector<2x128xi1>, vector<2x128xf32>
    %164 = vector.extract_strided_slice %163 {offsets = [0, 0], sizes = [2, 32], strides = [1, 1]} : vector<2x128xf32> to vector<2x32xf32>
    %165 = vector.extract_strided_slice %163 {offsets = [0, 32], sizes = [2, 32], strides = [1, 1]} : vector<2x128xf32> to vector<2x32xf32>
    %166 = vector.extract_strided_slice %163 {offsets = [0, 64], sizes = [2, 32], strides = [1, 1]} : vector<2x128xf32> to vector<2x32xf32>
    %167 = vector.extract_strided_slice %163 {offsets = [0, 96], sizes = [2, 32], strides = [1, 1]} : vector<2x128xf32> to vector<2x32xf32>
    %168 = arith.mulf %165, %132 : vector<2x32xf32>
    %169 = arith.mulf %164, %166 : vector<2x32xf32>
    %170 = arith.addf %168, %169 : vector<2x32xf32>
    %171 = math.tanh %170 : vector<2x32xf32>
    %172 = arith.mulf %167, %171 : vector<2x32xf32>
    %cst_31 = arith.constant dense<0.000000e+00> : vector<2x128xf32>
    %173 = tpu.matmul %172, %3, %cst_31 {dimension_numbers = #tpu.dot_dimension_numbers<[1], [0], [0], [1], [0, 0, 1, 1], [], []>} : vector<2x32xf32>, vector<32x128xf32>, vector<2x128xf32> -> vector<2x128xf32>
    %cst_32 = arith.constant dense<0.000000e+00> : vector<2x128xf32>
    %174 = tpu.matmul %154, %4, %cst_32 {dimension_numbers = #tpu.dot_dimension_numbers<[1], [0], [0], [1], [0, 0, 1, 1], [], []>} : vector<2x32xf32>, vector<32x128xf32>, vector<2x128xf32> -> vector<2x128xf32>
    %175 = arith.addf %173, %174 : vector<2x128xf32>
    %176 = arith.addf %175, %7 : vector<2x128xf32>
    %177 = arith.negf %176 : vector<2x128xf32>
    %178 = math.exp %177 : vector<2x128xf32>
    %cst_33 = arith.constant 1.000000e+00 : f32
    %179 = vector.broadcast %cst_33 : f32 to vector<2x128xf32>
    %180 = arith.addf %179, %178 : vector<2x128xf32>
    %181 = arith.divf %179, %180 : vector<2x128xf32>
    %182 = math.tanh %176 : vector<2x128xf32>
    %183 = arith.select %36, %182, %181 : vector<2x128xi1>, vector<2x128xf32>
    %184 = vector.extract_strided_slice %183 {offsets = [0, 0], sizes = [2, 32], strides = [1, 1]} : vector<2x128xf32> to vector<2x32xf32>
    %185 = vector.extract_strided_slice %183 {offsets = [0, 32], sizes = [2, 32], strides = [1, 1]} : vector<2x128xf32> to vector<2x32xf32>
    %186 = vector.extract_strided_slice %183 {offsets = [0, 64], sizes = [2, 32], strides = [1, 1]} : vector<2x128xf32> to vector<2x32xf32>
    %187 = vector.extract_strided_slice %183 {offsets = [0, 96], sizes = [2, 32], strides = [1, 1]} : vector<2x128xf32> to vector<2x32xf32>
    %188 = arith.mulf %185, %152 : vector<2x32xf32>
    %189 = arith.mulf %184, %186 : vector<2x32xf32>
    %190 = arith.addf %188, %189 : vector<2x32xf32>
    %191 = math.tanh %190 : vector<2x32xf32>
    %192 = arith.mulf %187, %191 : vector<2x32xf32>
    %cst_34 = arith.constant dense<0.000000e+00> : vector<2x128xf32>
    %193 = tpu.matmul %172, %2, %cst_34 {dimension_numbers = #tpu.dot_dimension_numbers<[1], [0], [0], [1], [0, 0, 1, 1], [], []>} : vector<2x32xf32>, vector<32x128xf32>, vector<2x128xf32> -> vector<2x128xf32>
    %194 = arith.addf %24, %193 : vector<2x128xf32>
    %195 = arith.negf %194 : vector<2x128xf32>
    %196 = math.exp %195 : vector<2x128xf32>
    %cst_35 = arith.constant 1.000000e+00 : f32
    %197 = vector.broadcast %cst_35 : f32 to vector<2x128xf32>
    %198 = arith.addf %197, %196 : vector<2x128xf32>
    %199 = arith.divf %197, %198 : vector<2x128xf32>
    %200 = math.tanh %194 : vector<2x128xf32>
    %201 = arith.select %36, %200, %199 : vector<2x128xi1>, vector<2x128xf32>
    %202 = vector.extract_strided_slice %201 {offsets = [0, 0], sizes = [2, 32], strides = [1, 1]} : vector<2x128xf32> to vector<2x32xf32>
    %203 = vector.extract_strided_slice %201 {offsets = [0, 32], sizes = [2, 32], strides = [1, 1]} : vector<2x128xf32> to vector<2x32xf32>
    %204 = vector.extract_strided_slice %201 {offsets = [0, 64], sizes = [2, 32], strides = [1, 1]} : vector<2x128xf32> to vector<2x32xf32>
    %205 = vector.extract_strided_slice %201 {offsets = [0, 96], sizes = [2, 32], strides = [1, 1]} : vector<2x128xf32> to vector<2x32xf32>
    %206 = arith.mulf %203, %170 : vector<2x32xf32>
    %207 = arith.mulf %202, %204 : vector<2x32xf32>
    %208 = arith.addf %206, %207 : vector<2x32xf32>
    %209 = math.tanh %208 : vector<2x32xf32>
    %210 = arith.mulf %205, %209 : vector<2x32xf32>
    %cst_36 = arith.constant dense<0.000000e+00> : vector<2x128xf32>
    %211 = tpu.matmul %210, %3, %cst_36 {dimension_numbers = #tpu.dot_dimension_numbers<[1], [0], [0], [1], [0, 0, 1, 1], [], []>} : vector<2x32xf32>, vector<32x128xf32>, vector<2x128xf32> -> vector<2x128xf32>
    %cst_37 = arith.constant dense<0.000000e+00> : vector<2x128xf32>
    %212 = tpu.matmul %192, %4, %cst_37 {dimension_numbers = #tpu.dot_dimension_numbers<[1], [0], [0], [1], [0, 0, 1, 1], [], []>} : vector<2x32xf32>, vector<32x128xf32>, vector<2x128xf32> -> vector<2x128xf32>
    %213 = arith.addf %211, %212 : vector<2x128xf32>
    %214 = arith.addf %213, %7 : vector<2x128xf32>
    %215 = arith.negf %214 : vector<2x128xf32>
    %216 = math.exp %215 : vector<2x128xf32>
    %cst_38 = arith.constant 1.000000e+00 : f32
    %217 = vector.broadcast %cst_38 : f32 to vector<2x128xf32>
    %218 = arith.addf %217, %216 : vector<2x128xf32>
    %219 = arith.divf %217, %218 : vector<2x128xf32>
    %220 = math.tanh %214 : vector<2x128xf32>
    %221 = arith.select %36, %220, %219 : vector<2x128xi1>, vector<2x128xf32>
    %222 = vector.extract_strided_slice %221 {offsets = [0, 0], sizes = [2, 32], strides = [1, 1]} : vector<2x128xf32> to vector<2x32xf32>
    %223 = vector.extract_strided_slice %221 {offsets = [0, 32], sizes = [2, 32], strides = [1, 1]} : vector<2x128xf32> to vector<2x32xf32>
    %224 = vector.extract_strided_slice %221 {offsets = [0, 64], sizes = [2, 32], strides = [1, 1]} : vector<2x128xf32> to vector<2x32xf32>
    %225 = vector.extract_strided_slice %221 {offsets = [0, 96], sizes = [2, 32], strides = [1, 1]} : vector<2x128xf32> to vector<2x32xf32>
    %226 = arith.mulf %223, %190 : vector<2x32xf32>
    %227 = arith.mulf %222, %224 : vector<2x32xf32>
    %228 = arith.addf %226, %227 : vector<2x32xf32>
    %229 = math.tanh %228 : vector<2x32xf32>
    %230 = arith.mulf %225, %229 : vector<2x32xf32>
    %cst_39 = arith.constant dense<0.000000e+00> : vector<2x128xf32>
    %231 = tpu.matmul %210, %2, %cst_39 {dimension_numbers = #tpu.dot_dimension_numbers<[1], [0], [0], [1], [0, 0, 1, 1], [], []>} : vector<2x32xf32>, vector<32x128xf32>, vector<2x128xf32> -> vector<2x128xf32>
    %232 = arith.addf %26, %231 : vector<2x128xf32>
    %233 = arith.negf %232 : vector<2x128xf32>
    %234 = math.exp %233 : vector<2x128xf32>
    %cst_40 = arith.constant 1.000000e+00 : f32
    %235 = vector.broadcast %cst_40 : f32 to vector<2x128xf32>
    %236 = arith.addf %235, %234 : vector<2x128xf32>
    %237 = arith.divf %235, %236 : vector<2x128xf32>
    %238 = math.tanh %232 : vector<2x128xf32>
    %239 = arith.select %36, %238, %237 : vector<2x128xi1>, vector<2x128xf32>
    %240 = vector.extract_strided_slice %239 {offsets = [0, 0], sizes = [2, 32], strides = [1, 1]} : vector<2x128xf32> to vector<2x32xf32>
    %241 = vector.extract_strided_slice %239 {offsets = [0, 32], sizes = [2, 32], strides = [1, 1]} : vector<2x128xf32> to vector<2x32xf32>
    %242 = vector.extract_strided_slice %239 {offsets = [0, 64], sizes = [2, 32], strides = [1, 1]} : vector<2x128xf32> to vector<2x32xf32>
    %243 = vector.extract_strided_slice %239 {offsets = [0, 96], sizes = [2, 32], strides = [1, 1]} : vector<2x128xf32> to vector<2x32xf32>
    %244 = arith.mulf %241, %208 : vector<2x32xf32>
    %245 = arith.mulf %240, %242 : vector<2x32xf32>
    %246 = arith.addf %244, %245 : vector<2x32xf32>
    %247 = math.tanh %246 : vector<2x32xf32>
    %248 = arith.mulf %243, %247 : vector<2x32xf32>
    %cst_41 = arith.constant dense<0.000000e+00> : vector<2x128xf32>
    %249 = tpu.matmul %248, %3, %cst_41 {dimension_numbers = #tpu.dot_dimension_numbers<[1], [0], [0], [1], [0, 0, 1, 1], [], []>} : vector<2x32xf32>, vector<32x128xf32>, vector<2x128xf32> -> vector<2x128xf32>
    %cst_42 = arith.constant dense<0.000000e+00> : vector<2x128xf32>
    %250 = tpu.matmul %230, %4, %cst_42 {dimension_numbers = #tpu.dot_dimension_numbers<[1], [0], [0], [1], [0, 0, 1, 1], [], []>} : vector<2x32xf32>, vector<32x128xf32>, vector<2x128xf32> -> vector<2x128xf32>
    %251 = arith.addf %249, %250 : vector<2x128xf32>
    %252 = arith.addf %251, %7 : vector<2x128xf32>
    %253 = arith.negf %252 : vector<2x128xf32>
    %254 = math.exp %253 : vector<2x128xf32>
    %cst_43 = arith.constant 1.000000e+00 : f32
    %255 = vector.broadcast %cst_43 : f32 to vector<2x128xf32>
    %256 = arith.addf %255, %254 : vector<2x128xf32>
    %257 = arith.divf %255, %256 : vector<2x128xf32>
    %258 = math.tanh %252 : vector<2x128xf32>
    %259 = arith.select %36, %258, %257 : vector<2x128xi1>, vector<2x128xf32>
    %260 = vector.extract_strided_slice %259 {offsets = [0, 0], sizes = [2, 32], strides = [1, 1]} : vector<2x128xf32> to vector<2x32xf32>
    %261 = vector.extract_strided_slice %259 {offsets = [0, 32], sizes = [2, 32], strides = [1, 1]} : vector<2x128xf32> to vector<2x32xf32>
    %262 = vector.extract_strided_slice %259 {offsets = [0, 64], sizes = [2, 32], strides = [1, 1]} : vector<2x128xf32> to vector<2x32xf32>
    %263 = vector.extract_strided_slice %259 {offsets = [0, 96], sizes = [2, 32], strides = [1, 1]} : vector<2x128xf32> to vector<2x32xf32>
    %264 = arith.mulf %261, %228 : vector<2x32xf32>
    %265 = arith.mulf %260, %262 : vector<2x32xf32>
    %266 = arith.addf %264, %265 : vector<2x32xf32>
    %267 = math.tanh %266 : vector<2x32xf32>
    %268 = arith.mulf %263, %267 : vector<2x32xf32>
    %cst_44 = arith.constant dense<0.000000e+00> : vector<2x128xf32>
    %269 = tpu.matmul %248, %2, %cst_44 {dimension_numbers = #tpu.dot_dimension_numbers<[1], [0], [0], [1], [0, 0, 1, 1], [], []>} : vector<2x32xf32>, vector<32x128xf32>, vector<2x128xf32> -> vector<2x128xf32>
    %270 = arith.addf %28, %269 : vector<2x128xf32>
    %271 = arith.negf %270 : vector<2x128xf32>
    %272 = math.exp %271 : vector<2x128xf32>
    %cst_45 = arith.constant 1.000000e+00 : f32
    %273 = vector.broadcast %cst_45 : f32 to vector<2x128xf32>
    %274 = arith.addf %273, %272 : vector<2x128xf32>
    %275 = arith.divf %273, %274 : vector<2x128xf32>
    %276 = math.tanh %270 : vector<2x128xf32>
    %277 = arith.select %36, %276, %275 : vector<2x128xi1>, vector<2x128xf32>
    %278 = vector.extract_strided_slice %277 {offsets = [0, 0], sizes = [2, 32], strides = [1, 1]} : vector<2x128xf32> to vector<2x32xf32>
    %279 = vector.extract_strided_slice %277 {offsets = [0, 32], sizes = [2, 32], strides = [1, 1]} : vector<2x128xf32> to vector<2x32xf32>
    %280 = vector.extract_strided_slice %277 {offsets = [0, 64], sizes = [2, 32], strides = [1, 1]} : vector<2x128xf32> to vector<2x32xf32>
    %281 = vector.extract_strided_slice %277 {offsets = [0, 96], sizes = [2, 32], strides = [1, 1]} : vector<2x128xf32> to vector<2x32xf32>
    %282 = arith.mulf %279, %246 : vector<2x32xf32>
    %283 = arith.mulf %278, %280 : vector<2x32xf32>
    %284 = arith.addf %282, %283 : vector<2x32xf32>
    %285 = math.tanh %284 : vector<2x32xf32>
    %286 = arith.mulf %281, %285 : vector<2x32xf32>
    %cst_46 = arith.constant dense<0.000000e+00> : vector<2x128xf32>
    %287 = tpu.matmul %286, %3, %cst_46 {dimension_numbers = #tpu.dot_dimension_numbers<[1], [0], [0], [1], [0, 0, 1, 1], [], []>} : vector<2x32xf32>, vector<32x128xf32>, vector<2x128xf32> -> vector<2x128xf32>
    %cst_47 = arith.constant dense<0.000000e+00> : vector<2x128xf32>
    %288 = tpu.matmul %268, %4, %cst_47 {dimension_numbers = #tpu.dot_dimension_numbers<[1], [0], [0], [1], [0, 0, 1, 1], [], []>} : vector<2x32xf32>, vector<32x128xf32>, vector<2x128xf32> -> vector<2x128xf32>
    %289 = arith.addf %287, %288 : vector<2x128xf32>
    %290 = arith.addf %289, %7 : vector<2x128xf32>
    %291 = arith.negf %290 : vector<2x128xf32>
    %292 = math.exp %291 : vector<2x128xf32>
    %cst_48 = arith.constant 1.000000e+00 : f32
    %293 = vector.broadcast %cst_48 : f32 to vector<2x128xf32>
    %294 = arith.addf %293, %292 : vector<2x128xf32>
    %295 = arith.divf %293, %294 : vector<2x128xf32>
    %296 = math.tanh %290 : vector<2x128xf32>
    %297 = arith.select %36, %296, %295 : vector<2x128xi1>, vector<2x128xf32>
    %298 = vector.extract_strided_slice %297 {offsets = [0, 0], sizes = [2, 32], strides = [1, 1]} : vector<2x128xf32> to vector<2x32xf32>
    %299 = vector.extract_strided_slice %297 {offsets = [0, 32], sizes = [2, 32], strides = [1, 1]} : vector<2x128xf32> to vector<2x32xf32>
    %300 = vector.extract_strided_slice %297 {offsets = [0, 64], sizes = [2, 32], strides = [1, 1]} : vector<2x128xf32> to vector<2x32xf32>
    %301 = vector.extract_strided_slice %297 {offsets = [0, 96], sizes = [2, 32], strides = [1, 1]} : vector<2x128xf32> to vector<2x32xf32>
    %302 = arith.mulf %299, %266 : vector<2x32xf32>
    %303 = arith.mulf %298, %300 : vector<2x32xf32>
    %304 = arith.addf %302, %303 : vector<2x32xf32>
    %305 = math.tanh %304 : vector<2x32xf32>
    %306 = arith.mulf %301, %305 : vector<2x32xf32>
    %cst_49 = arith.constant dense<0.000000e+00> : vector<2x128xf32>
    %307 = tpu.matmul %286, %2, %cst_49 {dimension_numbers = #tpu.dot_dimension_numbers<[1], [0], [0], [1], [0, 0, 1, 1], [], []>} : vector<2x32xf32>, vector<32x128xf32>, vector<2x128xf32> -> vector<2x128xf32>
    %308 = arith.addf %30, %307 : vector<2x128xf32>
    %309 = arith.negf %308 : vector<2x128xf32>
    %310 = math.exp %309 : vector<2x128xf32>
    %cst_50 = arith.constant 1.000000e+00 : f32
    %311 = vector.broadcast %cst_50 : f32 to vector<2x128xf32>
    %312 = arith.addf %311, %310 : vector<2x128xf32>
    %313 = arith.divf %311, %312 : vector<2x128xf32>
    %314 = math.tanh %308 : vector<2x128xf32>
    %315 = arith.select %36, %314, %313 : vector<2x128xi1>, vector<2x128xf32>
    %316 = vector.extract_strided_slice %315 {offsets = [0, 0], sizes = [2, 32], strides = [1, 1]} : vector<2x128xf32> to vector<2x32xf32>
    %317 = vector.extract_strided_slice %315 {offsets = [0, 32], sizes = [2, 32], strides = [1, 1]} : vector<2x128xf32> to vector<2x32xf32>
    %318 = vector.extract_strided_slice %315 {offsets = [0, 64], sizes = [2, 32], strides = [1, 1]} : vector<2x128xf32> to vector<2x32xf32>
    %319 = vector.extract_strided_slice %315 {offsets = [0, 96], sizes = [2, 32], strides = [1, 1]} : vector<2x128xf32> to vector<2x32xf32>
    %320 = arith.mulf %317, %284 : vector<2x32xf32>
    %321 = arith.mulf %316, %318 : vector<2x32xf32>
    %322 = arith.addf %320, %321 : vector<2x32xf32>
    %323 = math.tanh %322 : vector<2x32xf32>
    %324 = arith.mulf %319, %323 : vector<2x32xf32>
    %cst_51 = arith.constant dense<0.000000e+00> : vector<2x128xf32>
    %325 = tpu.matmul %324, %3, %cst_51 {dimension_numbers = #tpu.dot_dimension_numbers<[1], [0], [0], [1], [0, 0, 1, 1], [], []>} : vector<2x32xf32>, vector<32x128xf32>, vector<2x128xf32> -> vector<2x128xf32>
    %cst_52 = arith.constant dense<0.000000e+00> : vector<2x128xf32>
    %326 = tpu.matmul %306, %4, %cst_52 {dimension_numbers = #tpu.dot_dimension_numbers<[1], [0], [0], [1], [0, 0, 1, 1], [], []>} : vector<2x32xf32>, vector<32x128xf32>, vector<2x128xf32> -> vector<2x128xf32>
    %327 = arith.addf %325, %326 : vector<2x128xf32>
    %328 = arith.addf %327, %7 : vector<2x128xf32>
    %329 = arith.negf %328 : vector<2x128xf32>
    %330 = math.exp %329 : vector<2x128xf32>
    %cst_53 = arith.constant 1.000000e+00 : f32
    %331 = vector.broadcast %cst_53 : f32 to vector<2x128xf32>
    %332 = arith.addf %331, %330 : vector<2x128xf32>
    %333 = arith.divf %331, %332 : vector<2x128xf32>
    %334 = math.tanh %328 : vector<2x128xf32>
    %335 = arith.select %36, %334, %333 : vector<2x128xi1>, vector<2x128xf32>
    %336 = vector.extract_strided_slice %335 {offsets = [0, 0], sizes = [2, 32], strides = [1, 1]} : vector<2x128xf32> to vector<2x32xf32>
    %337 = vector.extract_strided_slice %335 {offsets = [0, 32], sizes = [2, 32], strides = [1, 1]} : vector<2x128xf32> to vector<2x32xf32>
    %338 = vector.extract_strided_slice %335 {offsets = [0, 64], sizes = [2, 32], strides = [1, 1]} : vector<2x128xf32> to vector<2x32xf32>
    %339 = vector.extract_strided_slice %335 {offsets = [0, 96], sizes = [2, 32], strides = [1, 1]} : vector<2x128xf32> to vector<2x32xf32>
    %340 = arith.mulf %337, %304 : vector<2x32xf32>
    %341 = arith.mulf %336, %338 : vector<2x32xf32>
    %342 = arith.addf %340, %341 : vector<2x32xf32>
    %343 = math.tanh %342 : vector<2x32xf32>
    %344 = arith.mulf %339, %343 : vector<2x32xf32>
    %cst_54 = arith.constant dense<0.000000e+00> : vector<2x128xf32>
    %345 = tpu.matmul %344, %8, %cst_54 {dimension_numbers = #tpu.dot_dimension_numbers<[1], [0], [0], [1], [0, 0, 1, 1], [], []>} : vector<2x32xf32>, vector<32x128xf32>, vector<2x128xf32> -> vector<2x128xf32>
    %346 = vector.broadcast %9 : vector<1x128xf32> to vector<2x128xf32>
    %347 = arith.addf %345, %346 : vector<2x128xf32>
    %348 = tpu.iota {dimensions = array<i32: 1>} : vector<2x128xi32>
    %c1_i32 = arith.constant 1 : i32
    %349 = vector.broadcast %c1_i32 : i32 to vector<2x128xi32>
    %350 = arith.cmpi eq, %348, %349 : vector<2x128xi32>
    %351 = arith.negf %347 : vector<2x128xf32>
    %352 = math.exp %351 : vector<2x128xf32>
    %cst_55 = arith.constant 1.000000e+00 : f32
    %353 = vector.broadcast %cst_55 : f32 to vector<2x128xf32>
    %354 = arith.addf %353, %352 : vector<2x128xf32>
    %355 = arith.divf %353, %354 : vector<2x128xf32>
    %356 = arith.select %350, %355, %347 : vector<2x128xi1>, vector<2x128xf32>
    %c0_56 = arith.constant 0 : index
    %c0_57 = arith.constant 0 : index
    %357 = vector.load %arg2[%c0_56, %c0_57] : memref<2x128xf32, #tpu.memory_space<vmem>>, vector<2x128xf32>
    tpu.vector_store %arg2[%c0_56, %c0_57], %356 {strides = array<i32>} : memref<2x128xf32, #tpu.memory_space<vmem>>, vector<2x128xf32>,
    return
  }
}

</mosaic_0001>

<bundles_post_ra>
// kernel: tpu_custom_call.1
= control target key start
LH: loop header
LB: loop body
LE: loop exit
PB: predicated region body
PF: predicated region fallthrough
CT: control target
= control target key end

     0   :  { %7 = vsyncpa [#allocation3], 0  ;;  %s3886_s0 = inlined_call_operand.vmem [shape: f32[16,3], index: 0, kind: input, shape index: {}]   ;;  %s3887_s1 = inlined_call_operand.hbm [shape: f32[160,128], index: 1, kind: input, shape index: {}]   ;;  %s3888_s2 = inlined_call_operand.hbm [shape: f32[2,128], index: 2, kind: output, shape index: {}]  }
   0x1   :  { %8 = vsyncpa [#allocation4], 0  ;;  %s3327_s9 = smov [#allocation2]  }
   0x2   :  { %s16_s10 = sshll.u32 %s3327_s9, 4  ;;  %s17_s10 = int_to_ptr.vmem [resolvable:$true] %s16_s10 }
   0x3   :  { %s3291_s11 = scalar_lea.vmem %s17_s10, 2560  ;;  %p3296_p1 = scmp.lt.s32.totalorder %s17_s10, %s17_s10 }
   0x4   :  { %p3292_p0 = scmp.ne.s32.totalorder %s17_s10, %s3291_s11  ;;  %p3297_p2 = scmp.lt.s32.totalorder %s3291_s11, %s3291_s11 }
   0x6   :  { %p3298_p3 = por %p3297_p2, %p3296_p1 }
   0x8   :  { %p3299_p4 = pnand %p3298_p3, %p3292_p0 }
   0xa   :  { %3302 = shalt.err (!%p3299_p4)
}
   0xb   :  { %s3328_s12 = smov 128   ;;  %s3329_s13 = smov 8  }
   0xc   :  { %22 = dma.hbm_to_vmem [thread:$0]  %s3887_s1, 2560, %s17_s10, [#allocation3], %s3328_s12, %s3328_s12, %s3329_s13  }
   0xd   :  { %3323 = dma.done.wait [#allocation3], 2560  }
   0xe   :  { %3324 = vsyncadd [#allocation3], 4294964736  ;;  %v3330_v0 = vmov 0.0   ;;  %vm3331_vm0 = vmmov 0   ;;  %vm63_vm1 = vcmask 1042432   ;;  %v3356_v1 = vld [vmem:[#allocation2 + $0x28] sm:$0xff]  ;;  %v142_v24 = vlaneseq }
   0xf   :  { %2807 = vmatprep.subr.mxu1 %v3330_v0  ;;  %2815 = vmatprep.mubr.msk.f32.mxu1 %vm3331_vm0, %v3330_v0  ;;  %v26_v2 = vld [vmem:[#allocation2] sm:$0x7]  ;;  %vm56_vm2 = vcmask 23552   ;;  %v51_v5 = vld [vmem:[%s3886_s0 + $0x8] sm:$0xff]  ;;  %v3368_v6 = vld [vmem:[#allocation2 + $0x18] sm:$0xff]  ;;  %vm244_vm5 = vcmask 1041409  }
  0x10   :  { %v50_v3 = vld [vmem:[%s3886_s0] sm:$0xff]  ;;  %2808 = vmatpush3.msra.mxu1 %v3356_v1  ;;  %2802 = vmatprep.subr.msk.mxu0 %vm63_vm1, %v26_v2  ;;  %v3372_v7 = vld [vmem:[#allocation2 + $0x10] sm:$0xff]  ;;  %v2621_v9 = vld [vmem:[#allocation2 + $0x8] ss:$0 sm:$0xff]  ;;  %v3390_v25 = vand.u32 127, %v142_v24  ;;  %s3332_s0 = smov 64  }
  0x11   :  { %v3362_v4 = vld [vmem:[#allocation2 + $0x20] sm:$0xff]  ;;  %2809 = vmatprep.subr.mxu1 %v3330_v0  ;;  %2803 = vmatpush3.msk.msra.mxu0 %vm63_vm1, %v26_v2  ;;  %s3333_s19 = smov 32   ;;  %v3407_v41 = vld [vmem:[#allocation2 + $0x68] sm:$0xff]  ;;  %v3417_v45 = vld [vmem:[#allocation2 + $0x58] sm:$0xff]  ;;  %vm147_vm7 = vcmask 261120   ;;  %s3334_s20 = smov [#allocation5]  }
  0x12   :  { %2804 = vmatprep.mubr.msk.f32.mxu0 %vm56_vm2, %v50_v3  ;;  %2810 = vmatpush3.msra.mxu1 %v3362_v4  ;;  %vm144_vm3 = vcmp.ge.s32.totalorder %v3390_v25, 64  ;;  %vm145_vm4 = vcmp.lt.s32.totalorder %v3390_v25, 96  ;;  %v3409_v42 = vld [vmem:[#allocation2 + $0x60] sm:$0xff]  ;;  %v3412_v43 = vld [vmem:[#allocation2 + $0x48] sm:$0xff]  ;;  %v3422_v46 = vld [vmem:[#allocation2 + $0x38] sm:$0xff]  ;;  %s2611_s21 = sshll.u32 %s3334_s20, 4  ;;  %s2612_s21 = int_to_ptr.vmem [resolvable:$true] %s2611_s21 }
  0x13   :  { %2805 = vmatmul.mubr.msk.f32.vlgmr.msra.gmra.mxu0 %vm56_vm2, %v51_v5  ;;  %2811 = vmatprep.subr.mxu1 %v3330_v0  ;;  %vm3394_vm6 = vmand %vm144_vm3, %vm145_vm4  ;;  %v3414_v44 = vld [vmem:[#allocation2 + $0x40] sm:$0xff]  ;;  %v3425_v47 = vld [vmem:[#allocation2 + $0x50] sm:$0xff]  ;;  %vm2596_vm8 = vcmp.eq.s32.totalorder %v3390_v25, 1  ;;  %s3303_s22 = scalar_lea.vmem %s2612_s21, 32  ;;  %p3308_p6 = scmp.lt.s32.totalorder %s2612_s21, %s2612_s21 }
  0x14   :  { %2812 = vmatpush3.msra.mxu1 %v3368_v6  ;;  %2818 = vmatprep.subr.mxu0 %v3330_v0  ;;  %v3432_v48 = vld [vmem:[#allocation2 + $0x30] sm:$0xff]  ;;  %v45_v30 = vld [vmem:[#allocation2 + $0x78] sm:$0xff]  ;;  %p3304_p5 = scmp.ne.s32.totalorder %s2612_s21, %s3303_s22  ;;  %p3309_p7 = scmp.lt.s32.totalorder %s3303_s22, %s3303_s22 }
  0x15   :  { %2813 = vmatprep.subr.mxu1 %v3330_v0  ;;  %2826 = vmatprep.mubr.msk.f32.mxu0 %vm3331_vm0, %v3330_v0  ;;  %v3474_v55 = vld [vmem:[#allocation2 + $0x70] ss:$0 sm:$0xff] }
  0x16   :  { %2814 = vmatpush3.msra.mxu1 %v3372_v7  ;;  %2819 = vmatpush3.msra.mxu0 %v3407_v41  ;;  %p3310_p8 = por %p3309_p7, %p3308_p6 }
  0x17   :  { %2816 = vmatmul.mubr.f32.vlgmr.msra.gmra.mxu1 %v3330_v0  ;;  %2829 = vmatprep.subr.mxu1 %v3330_v0 }
  0x18   :  { %2837 = vmatprep.mubr.msk.f32.mxu1 %vm3331_vm0, %v3330_v0  ;;  %2820 = vmatprep.subr.mxu0 %v3330_v0  ;;  %p3311_p9 = pnand %p3310_p8, %p3304_p5 }
  0x19   :  { %2830 = vmatpush3.msra.mxu1 %v3412_v43  ;;  %2821 = vmatpush3.msra.mxu0 %v3409_v42 }
  0x1a   :  { %2831 = vmatprep.subr.mxu1 %v3330_v0  ;;  %2822 = vmatprep.subr.mxu0 %v3330_v0 }
  0x1b   :  { %2832 = vmatpush3.msra.mxu1 %v3414_v44  ;;  %2823 = vmatpush3.msra.mxu0 %v3417_v45 }
  0x1c   :  { %2833 = vmatprep.subr.mxu1 %v3330_v0  ;;  %2824 = vmatprep.subr.mxu0 %v3330_v0 }
  0x1d   :  { %2834 = vmatpush3.msra.mxu1 %v3422_v46  ;;  %2825 = vmatpush3.msra.mxu0 %v3425_v47 }
  0x1e   :  { %2835 = vmatprep.subr.mxu1 %v3330_v0  ;;  %2827 = vmatmul.mubr.f32.vlgmr.msra.gmra.mxu0 %v3330_v0 }
  0x1f   :  { %2840 = vmatprep.subr.mxu0 %v3330_v0  ;;  %2836 = vmatpush3.msra.mxu1 %v3432_v48 }
  0x20   :  { %2841 = vmatpush3.msra.mxu0 %v3356_v1  ;;  %2848 = vmatprep.mubr.msk.f32.mxu0 %vm3331_vm0, %v3330_v0 }
  0x21   :  { %2842 = vmatprep.subr.mxu0 %v3330_v0  ;;  %2851 = vmatprep.subr.mxu1 %v3330_v0 }
  0x22   :  { %2843 = vmatpush3.msra.mxu0 %v3362_v4 }
  0x23   :  { %2844 = vmatprep.subr.mxu0 %v3330_v0 }
  0x24   :  { %2845 = vmatpush3.msra.mxu0 %v3368_v6 }
  0x25   :  { %2846 = vmatprep.subr.mxu0 %v3330_v0 }
  0x26   :  { %2847 = vmatpush3.msra.mxu0 %v3372_v7 }
  0x27   :  { %2862 = vmatprep.subr.mxu0 %v3330_v0 }
  0xd3   :  { %v2806_v8 = vpop.f32.mrf.mxu0 }
  0xd4   :  { %v3384_v11 = vadd.f32 %v2806_v8, %v2621_v9 }
  0xd5   :  { %v133_v10 = vpop.f32.mrf.mxu0 }
  0xd6   :  { %v3386_v12 = vadd.f32 %v2621_v9, %v133_v10 }
  0xd7   :  { %v217_v13 = vpop.f32.mrf.mxu1 }
  0xd8   :  { %v222_v14 = vrot.slane %v217_v13, 1  ;;  %v225_v15 = vadd.f32 %v217_v13, %v3386_v12 }
  0xd9   :  { %v2817_v16 = vpop.f32.mrf.mxu1 }
  0xda   :  { %v226_v17 = vadd.f32 %v222_v14, %v3384_v11  ;;  %v2625_v18 = vmul.f32 -1.442695, %v225_v15 }
  0xdc   :  { %3090 = vpow2.f32 %v2625_v18  ;;  %v2626_v19 = vmul.f32 -1.442695, %v226_v17 }
  0xde   :  { %3092 = vpow2.f32 %v2626_v19  ;;  %v336_v52 = vpop.f32.mrf.mxu0 }
  0xdf   :  { %3094 = vtanh.f32 %v226_v17 }
  0xe0   :  { %v2828_v53 = vpop.f32.mrf.mxu0 }
  0xe9   :  { %v3091_v20 = vpop.eup %3090 }
  0xea   :  { %v233_v22 = vadd.f32 1.0, %v3091_v20 }
  0xeb   :  { %v3093_v21 = vpop.eup %3092 }
  0xec   :  { %v234_v23 = vadd.f32 1.0, %v3093_v21  ;;  %v3095_v26 = vpop.eup %3094 }
  0xed   :  { %v243_v27 = vrot.slane %v3095_v26, 7 }
  0xee   :  { %3096 = vrcp.f32 %v234_v23 }
  0xef   :  { %3098 = vtanh.f32 %v225_v15 }
  0xf0   :  { %3100 = vrcp.f32 %v233_v22 }
  0xfb   :  { %v3097_v28 = vpop.eup %3096 }
  0xfc   :  { %v3099_v29 = vpop.eup %3098  ;;  %v249_v31 = vrot.slane %v3097_v28, 7 }
  0xfd   :  { %v3101_v32 = vpop.eup %3100  ;;  %v245_v33 = vsel %vm244_vm5, %v243_v27, %v3099_v29 }
  0xfe   :  { %v250_v34 = vsel %vm244_vm5, %v249_v31, %v3101_v32 }
  0xff   :  { %v252_v35 = vsel %vm3394_vm6, %v245_v33, %v250_v34 }
 0x100   :  { %255 = vrot.lane.b32.xlu0 %v252_v35, %s3332_s0  ;;  %v253_v38 = vmul.f32 0.0, %v252_v35 }
 0x172   :  { %v256_v36 = vpop.permute.xlu0 %255 }
 0x173   :  { %v258_v37 = vmul.f32 %v256_v36, %v252_v35 }
 0x175   :  { %260 = vrot.lane.b32.xlu0 %v258_v37, %s3333_s19 }
 0x1e7   :  { %v261_v39 = vpop.permute.xlu0 %260 }
 0x1e8   :  { %v3404_v40 = vadd.f32 %v261_v39, %v253_v38 }
 0x1ea   :  { %3102 = vtanh.f32 %v3404_v40 }
 0x1f7   :  { %v3103_v49 = vpop.eup %3102 }
 0x1f8   :  { %266 = vrot.lane.b32.xlu1 %v3103_v49, %s3332_s0 }
 0x26a   :  { %v267_v50 = vpop.permute.xlu1 %266 }
 0x26b   :  { %v269_v51 = vmul.f32 %v267_v50, %v252_v35 }
 0x26d   :  { %341 = vrot.lane.b32.xlu1 %v269_v51, %s3333_s19 }
 0x2df   :  { %v342_v54 = vpop.permute.xlu1 %341 }
 0x2e0   :  { %2838 = vmatmul.mubr.msk.f32.vlgmr.msra.gmra.mxu1 %vm147_vm7, %v342_v54  ;;  %2849 = vmatmul.mubr.msk.f32.vlgmr.msra.gmra.mxu0 %vm147_vm7, %v342_v54 }
 0x2e1   :  { %2852 = vmatpush3.msra.mxu1 %v3407_v41  ;;  %2863 = vmatpush3.msra.mxu0 %v3412_v43 }
 0x2e2   :  { %2853 = vmatprep.subr.mxu1 %v3330_v0  ;;  %2864 = vmatprep.subr.mxu0 %v3330_v0 }
 0x2e3   :  { %2854 = vmatpush3.msra.mxu1 %v3409_v42  ;;  %2865 = vmatpush3.msra.mxu0 %v3414_v44 }
 0x2e4   :  { %2855 = vmatprep.subr.mxu1 %v3330_v0  ;;  %2859 = vmatprep.mubr.msk.f32.mxu1 %vm3331_vm0, %v3330_v0 }
 0x2e5   :  { %2856 = vmatpush3.msra.mxu1 %v3417_v45  ;;  %2866 = vmatprep.subr.mxu0 %v3330_v0 }
 0x2e6   :  { %2857 = vmatprep.subr.mxu1 %v3330_v0  ;;  %2867 = vmatpush3.msra.mxu0 %v3422_v46 }
 0x2e7   :  { %2858 = vmatpush3.msra.mxu1 %v3425_v47  ;;  %2868 = vmatprep.subr.mxu0 %v3330_v0 }
 0x2e8   :  { %2873 = vmatprep.subr.mxu1 %v3330_v0  ;;  %2869 = vmatpush3.msra.mxu0 %v3432_v48 }
 0x2e9   :  { %2870 = vmatprep.mubr.msk.f32.mxu0 %vm3331_vm0, %v3330_v0  ;;  %2884 = vmatprep.subr.mxu0 %v3330_v0 }
 0x3a0   :  { %v411_v56 = vpop.f32.mrf.mxu1  ;;  %v507_v57 = vpop.f32.mrf.mxu0 }
 0x3a1   :  { %v412_v58 = vadd.f32 %v411_v56, %v336_v52  ;;  %v512_v59 = vrot.slane %v507_v57, 7  ;;  %v516_v60 = vadd.f32 %v507_v57, %v3384_v11 }
 0x3a2   :  { %v2839_v61 = vpop.f32.mrf.mxu1  ;;  %v2850_v62 = vpop.f32.mrf.mxu0 }
 0x3a3   :  { %v415_v63 = vadd.f32 %v3474_v55, %v412_v58  ;;  %v515_v2 = vadd.f32 %v512_v59, %v3386_v12  ;;  %v2631_v3 = vmul.f32 -1.442695, %v516_v60 }
 0x3a5   :  { %v2628_v5 = vmul.f32 -1.442695, %v415_v63  ;;  %v2630_v8 = vmul.f32 -1.442695, %v515_v2  ;;  %3104 = vpow2.f32 %v2631_v3 }
 0x3a7   :  { %3106 = vpow2.f32 %v2628_v5 }
 0x3a8   :  { %3108 = vpow2.f32 %v2630_v8 }
 0x3a9   :  { %3110 = vtanh.f32 %v515_v2 }
 0x3aa   :  { %3112 = vtanh.f32 %v415_v63 }
 0x3b2   :  { %v3105_v9 = vpop.eup %3104 }
 0x3b3   :  { %v524_v16 = vadd.f32 1.0, %v3105_v9 }
 0x3b4   :  { %v3107_v10 = vpop.eup %3106 }
 0x3b5   :  { %v3109_v13 = vpop.eup %3108  ;;  %v419_v14 = vadd.f32 1.0, %v3107_v10 }
 0x3b6   :  { %v523_v15 = vadd.f32 1.0, %v3109_v13  ;;  %v3111_v17 = vpop.eup %3110 }
 0x3b7   :  { %3114 = vrcp.f32 %v419_v14  ;;  %v3113_v18 = vpop.eup %3112  ;;  %v533_v20 = vrot.slane %v3111_v17, 1 }
 0x3b8   :  { %3116 = vrcp.f32 %v523_v15 }
 0x3b9   :  { %3118 = vtanh.f32 %v516_v60 }
 0x3ba   :  { %3120 = vrcp.f32 %v524_v16 }
 0x3c4   :  { %v3115_v19 = vpop.eup %3114 }
 0x3c5   :  { %v3117_v21 = vpop.eup %3116  ;;  %v423_v22 = vsel %vm3394_vm6, %v3113_v18, %v3115_v19 }
 0x3c6   :  { %v3119_v23 = vpop.eup %3118  ;;  %426 = vrot.lane.b32.xlu0 %v423_v22, %s3332_s0  ;;  %v538_v24 = vrot.slane %v3117_v21, 1  ;;  %v424_v35 = vmul.f32 0.0, %v423_v22 }
 0x3c7   :  { %v3121_v26 = vpop.eup %3120  ;;  %v534_v27 = vsel %vm244_vm5, %v3119_v23, %v533_v20 }
 0x3c8   :  { %v539_v28 = vsel %vm244_vm5, %v3121_v26, %v538_v24 }
 0x3c9   :  { %v541_v29 = vsel %vm3394_vm6, %v534_v27, %v539_v28 }
 0x3ca   :  { %544 = vrot.lane.b32.xlu1 %v541_v29, %s3332_s0  ;;  %v542_v38 = vmul.f32 %v541_v29, %v3404_v40 }
 0x438   :  { %v427_v31 = vpop.permute.xlu0 %426 }
 0x439   :  { %v429_v32 = vmul.f32 %v427_v31, %v423_v22 }
 0x43b   :  { %431 = vrot.lane.b32.xlu0 %v429_v32, %s3333_s19 }
 0x43c   :  { %v545_v33 = vpop.permute.xlu1 %544 }
 0x43d   :  { %v547_v34 = vmul.f32 %v545_v33, %v541_v29 }
 0x43f   :  { %549 = vrot.lane.b32.xlu1 %v547_v34, %s3333_s19 }
 0x4ad   :  { %v432_v36 = vpop.permute.xlu0 %431 }
 0x4ae   :  { %v3489_v37 = vadd.f32 %v432_v36, %v424_v35 }
 0x4b0   :  { %3122 = vtanh.f32 %v3489_v37 }
 0x4b1   :  { %v550_v39 = vpop.permute.xlu1 %549 }
 0x4b2   :  { %v3493_v49 = vadd.f32 %v550_v39, %v542_v38 }
 0x4b4   :  { %3124 = vtanh.f32 %v3493_v49 }
 0x4bd   :  { %v3123_v50 = vpop.eup %3122 }
 0x4be   :  { %437 = vrot.lane.b32.xlu0 %v3123_v50, %s3332_s0 }
 0x4c1   :  { %v3125_v51 = vpop.eup %3124 }
 0x4c2   :  { %555 = vrot.lane.b32.xlu1 %v3125_v51, %s3332_s0 }
 0x530   :  { %v438_v52 = vpop.permute.xlu0 %437 }
 0x531   :  { %v440_v53 = vmul.f32 %v438_v52, %v423_v22 }
 0x533   :  { %560 = vrot.lane.b32.xlu0 %v440_v53, %s3333_s19 }
 0x534   :  { %v556_v54 = vpop.permute.xlu1 %555 }
 0x535   :  { %v558_v56 = vmul.f32 %v556_v54, %v541_v29 }
 0x537   :  { %635 = vrot.lane.b32.xlu1 %v558_v56, %s3333_s19 }
 0x5a5   :  { %v561_v40 = vpop.permute.xlu0 %560 }
 0x5a6   :  { %2860 = vmatmul.mubr.msk.f32.vlgmr.msra.gmra.mxu1 %vm147_vm7, %v561_v40 }
 0x5a7   :  { %2874 = vmatpush3.msra.mxu1 %v3356_v1  ;;  %2881 = vmatprep.mubr.msk.f32.mxu1 %vm3331_vm0, %v3330_v0 }
 0x5a8   :  { %2875 = vmatprep.subr.mxu1 %v3330_v0 }
 0x5a9   :  { %v636_v57 = vpop.permute.xlu1 %635  ;;  %2876 = vmatpush3.msra.mxu1 %v3362_v4 }
 0x5aa   :  { %2871 = vmatmul.mubr.msk.f32.vlgmr.msra.gmra.mxu0 %vm147_vm7, %v636_v57  ;;  %2877 = vmatprep.subr.mxu1 %v3330_v0 }
 0x5ab   :  { %2878 = vmatpush3.msra.mxu1 %v3368_v6  ;;  %2885 = vmatpush3.msra.mxu0 %v3407_v41 }
 0x5ac   :  { %2879 = vmatprep.subr.mxu1 %v3330_v0  ;;  %2886 = vmatprep.subr.mxu0 %v3330_v0 }
 0x5ad   :  { %2880 = vmatpush3.msra.mxu1 %v3372_v7  ;;  %2887 = vmatpush3.msra.mxu0 %v3409_v42 }
 0x5ae   :  { %2882 = vmatmul.mubr.msk.f32.vlgmr.msra.gmra.mxu1 %vm147_vm7, %v636_v57  ;;  %2888 = vmatprep.subr.mxu0 %v3330_v0 }
 0x5af   :  { %2889 = vmatpush3.msra.mxu0 %v3417_v45  ;;  %2892 = vmatprep.mubr.msk.f32.mxu0 %vm3331_vm0, %v3330_v0 }
 0x5b0   :  { %2890 = vmatprep.subr.mxu0 %v3330_v0  ;;  %2895 = vmatprep.subr.mxu1 %v3330_v0 }
 0x5b1   :  { %2891 = vmatpush3.msra.mxu0 %v3425_v47  ;;  %2896 = vmatpush3.msra.mxu1 %v3412_v43 }
 0x5b2   :  { %2906 = vmatprep.subr.mxu0 %v3330_v0  ;;  %2897 = vmatprep.subr.mxu1 %v3330_v0 }
 0x5b3   :  { %2898 = vmatpush3.msra.mxu1 %v3414_v44  ;;  %2903 = vmatprep.mubr.msk.f32.mxu1 %vm3331_vm0, %v3330_v0 }
 0x5b4   :  { %2899 = vmatprep.subr.mxu1 %v3330_v0 }
 0x5b5   :  { %2900 = vmatpush3.msra.mxu1 %v3422_v46 }
 0x5b6   :  { %2901 = vmatprep.subr.mxu1 %v3330_v0 }
 0x5b7   :  { %2902 = vmatpush3.msra.mxu1 %v3432_v48 }
 0x5b8   :  { %2917 = vmatprep.subr.mxu1 %v3330_v0 }
 0x666   :  { %v630_v58 = vpop.f32.mrf.mxu1 }
 0x668   :  { %v2861_v59 = vpop.f32.mrf.mxu1 }
 0x66a   :  { %v705_v60 = vpop.f32.mrf.mxu0 }
 0x66b   :  { %v706_v61 = vadd.f32 %v705_v60, %v630_v58 }
 0x66c   :  { %v2872_v62 = vpop.f32.mrf.mxu0 }
 0x66d   :  { %v709_v63 = vadd.f32 %v3474_v55, %v706_v61 }
 0x66e   :  { %v801_v2 = vpop.f32.mrf.mxu1 }
 0x66f   :  { %v2634_v3 = vmul.f32 -1.442695, %v709_v63  ;;  %v806_v5 = vrot.slane %v801_v2, 6  ;;  %v807_v8 = vrot.slane %v801_v2, 7 }
 0x670   :  { %v2883_v9 = vpop.f32.mrf.mxu1 }
 0x671   :  { %3126 = vpow2.f32 %v2634_v3  ;;  %v810_v10 = vadd.f32 %v806_v5, %v3386_v12  ;;  %v811_v13 = vadd.f32 %v807_v8, %v3384_v11 }
 0x673   :  { %v2636_v14 = vmul.f32 -1.442695, %v810_v10  ;;  %v2637_v15 = vmul.f32 -1.442695, %v811_v13 }
 0x675   :  { %3128 = vpow2.f32 %v2636_v14 }
 0x676   :  { %3130 = vpow2.f32 %v2637_v15 }
 0x677   :  { %3132 = vtanh.f32 %v709_v63 }
 0x678   :  { %3134 = vtanh.f32 %v810_v10 }
 0x67e   :  { %v3127_v16 = vpop.eup %3126 }
 0x67f   :  { %v713_v17 = vadd.f32 1.0, %v3127_v16 }
 0x681   :  { %3136 = vrcp.f32 %v713_v17 }
 0x682   :  { %v3129_v18 = vpop.eup %3128  ;;  %3138 = vtanh.f32 %v811_v13 }
 0x683   :  { %v3131_v19 = vpop.eup %3130  ;;  %v818_v20 = vadd.f32 1.0, %v3129_v18 }
 0x684   :  { %v819_v21 = vadd.f32 1.0, %v3131_v19  ;;  %v3133_v22 = vpop.eup %3132 }
 0x685   :  { %3140 = vrcp.f32 %v818_v20  ;;  %v3135_v23 = vpop.eup %3134 }
 0x686   :  { %3142 = vrcp.f32 %v819_v21  ;;  %v828_v29 = vrot.slane %v3135_v23, 2 }
 0x68e   :  { %v3137_v24 = vpop.eup %3136 }
 0x68f   :  { %v3139_v26 = vpop.eup %3138  ;;  %v717_v27 = vsel %vm3394_vm6, %v3133_v22, %v3137_v24 }
 0x690   :  { %720 = vrot.lane.b32.xlu0 %v717_v27, %s3332_s0  ;;  %v829_v31 = vrot.slane %v3139_v26, 1  ;;  %v718_v53 = vmul.f32 %v717_v27, %v3489_v37 }
 0x692   :  { %v3141_v28 = vpop.eup %3140  ;;  %v830_v35 = vsel %vm244_vm5, %v829_v31, %v828_v29 }
 0x693   :  { %v3143_v32 = vpop.eup %3142  ;;  %v834_v33 = vrot.slane %v3141_v28, 2 }
 0x694   :  { %v835_v34 = vrot.slane %v3143_v32, 1 }
 0x696   :  { %v836_v36 = vsel %vm244_vm5, %v835_v34, %v834_v33 }
 0x697   :  { %v838_v38 = vsel %vm3394_vm6, %v830_v35, %v836_v36 }
 0x698   :  { %841 = vrot.lane.b32.xlu1 %v838_v38, %s3332_s0  ;;  %v839_v40 = vmul.f32 %v838_v38, %v3493_v49 }
 0x702   :  { %v721_v39 = vpop.permute.xlu0 %720 }
 0x703   :  { %v723_v50 = vmul.f32 %v721_v39, %v717_v27 }
 0x705   :  { %725 = vrot.lane.b32.xlu0 %v723_v50, %s3333_s19 }
 0x70a   :  { %v842_v51 = vpop.permute.xlu1 %841 }
 0x70b   :  { %v844_v52 = vmul.f32 %v842_v51, %v838_v38 }
 0x70d   :  { %846 = vrot.lane.b32.xlu1 %v844_v52, %s3333_s19 }
 0x777   :  { %v726_v54 = vpop.permute.xlu0 %725 }
 0x778   :  { %v3547_v56 = vadd.f32 %v726_v54, %v718_v53 }
 0x77a   :  { %3144 = vtanh.f32 %v3547_v56 }
 0x77f   :  { %v847_v57 = vpop.permute.xlu1 %846 }
 0x780   :  { %v3551_v58 = vadd.f32 %v847_v57, %v839_v40 }
 0x782   :  { %3146 = vtanh.f32 %v3551_v58 }
 0x787   :  { %v3145_v59 = vpop.eup %3144 }
 0x788   :  { %731 = vrot.lane.b32.xlu0 %v3145_v59, %s3332_s0 }
 0x78f   :  { %v3147_v60 = vpop.eup %3146 }
 0x790   :  { %852 = vrot.lane.b32.xlu1 %v3147_v60, %s3332_s0 }
 0x7fa   :  { %v732_v61 = vpop.permute.xlu0 %731 }
 0x7fb   :  { %v734_v37 = vmul.f32 %v732_v61, %v717_v27 }
 0x7fd   :  { %857 = vrot.lane.b32.xlu0 %v734_v37, %s3333_s19 }
 0x802   :  { %v853_v62 = vpop.permute.xlu1 %852 }
 0x803   :  { %v855_v63 = vmul.f32 %v853_v62, %v838_v38 }
 0x805   :  { %932 = vrot.lane.b32.xlu1 %v855_v63, %s3333_s19 }
 0x86f   :  { %v858_v49 = vpop.permute.xlu0 %857 }
 0x870   :  { %2893 = vmatmul.mubr.msk.f32.vlgmr.msra.gmra.mxu0 %vm147_vm7, %v858_v49 }
 0x871   :  { %2907 = vmatpush3.msra.mxu0 %v3356_v1  ;;  %2914 = vmatprep.mubr.msk.f32.mxu0 %vm3331_vm0, %v3330_v0 }
 0x872   :  { %2908 = vmatprep.subr.mxu0 %v3330_v0 }
 0x873   :  { %2909 = vmatpush3.msra.mxu0 %v3362_v4 }
 0x874   :  { %2910 = vmatprep.subr.mxu0 %v3330_v0 }
 0x875   :  { %2911 = vmatpush3.msra.mxu0 %v3368_v6 }
 0x876   :  { %2912 = vmatprep.subr.mxu0 %v3330_v0 }
 0x877   :  { %2913 = vmatpush3.msra.mxu0 %v3372_v7  ;;  %v933_v2 = vpop.permute.xlu1 %932 }
 0x878   :  { %2904 = vmatmul.mubr.msk.f32.vlgmr.msra.gmra.mxu1 %vm147_vm7, %v933_v2  ;;  %2915 = vmatmul.mubr.msk.f32.vlgmr.msra.gmra.mxu0 %vm147_vm7, %v933_v2 }
 0x879   :  { %2918 = vmatpush3.msra.mxu1 %v3407_v41  ;;  %2928 = vmatprep.subr.mxu0 %v3330_v0 }
 0x87a   :  { %2919 = vmatprep.subr.mxu1 %v3330_v0  ;;  %2929 = vmatpush3.msra.mxu0 %v3412_v43 }
 0x87b   :  { %2920 = vmatpush3.msra.mxu1 %v3409_v42  ;;  %2930 = vmatprep.subr.mxu0 %v3330_v0 }
 0x87c   :  { %2921 = vmatprep.subr.mxu1 %v3330_v0  ;;  %2931 = vmatpush3.msra.mxu0 %v3414_v44 }
 0x87d   :  { %2922 = vmatpush3.msra.mxu1 %v3417_v45  ;;  %2925 = vmatprep.mubr.msk.f32.mxu1 %vm3331_vm0, %v3330_v0 }
 0x87e   :  { %2923 = vmatprep.subr.mxu1 %v3330_v0  ;;  %2932 = vmatprep.subr.mxu0 %v3330_v0 }
 0x87f   :  { %2924 = vmatpush3.msra.mxu1 %v3425_v47  ;;  %2933 = vmatpush3.msra.mxu0 %v3422_v46 }
 0x880   :  { %2939 = vmatprep.subr.mxu1 %v3330_v0  ;;  %2934 = vmatprep.subr.mxu0 %v3330_v0 }
 0x881   :  { %2935 = vmatpush3.msra.mxu0 %v3432_v48  ;;  %2936 = vmatprep.mubr.msk.f32.mxu0 %vm3331_vm0, %v3330_v0 }
 0x882   :  { %2950 = vmatprep.subr.mxu0 %v3330_v0 }
 0x930   :  { %v927_v3 = vpop.f32.mrf.mxu0 }
 0x932   :  { %v2894_v5 = vpop.f32.mrf.mxu0 }
 0x938   :  { %v1002_v8 = vpop.f32.mrf.mxu1  ;;  %v1098_v9 = vpop.f32.mrf.mxu0 }
 0x939   :  { %v1003_v10 = vadd.f32 %v1002_v8, %v927_v3  ;;  %v1103_v13 = vrot.slane %v1098_v9, 5  ;;  %v1104_v14 = vrot.slane %v1098_v9, 6 }
 0x93a   :  { %v2905_v15 = vpop.f32.mrf.mxu1  ;;  %v2916_v16 = vpop.f32.mrf.mxu0 }
 0x93b   :  { %v1006_v17 = vadd.f32 %v3474_v55, %v1003_v10  ;;  %v1107_v18 = vadd.f32 %v1103_v13, %v3386_v12  ;;  %v1108_v19 = vadd.f32 %v1104_v14, %v3384_v11 }
 0x93d   :  { %v2640_v20 = vmul.f32 -1.442695, %v1006_v17  ;;  %v2642_v21 = vmul.f32 -1.442695, %v1107_v18  ;;  %v2643_v22 = vmul.f32 -1.442695, %v1108_v19 }
 0x93f   :  { %3148 = vpow2.f32 %v2640_v20 }
 0x940   :  { %3150 = vpow2.f32 %v2642_v21 }
 0x941   :  { %3152 = vpow2.f32 %v2643_v22 }
 0x942   :  { %3154 = vtanh.f32 %v1107_v18 }
 0x943   :  { %3156 = vtanh.f32 %v1108_v19 }
 0x944   :  { %3158 = vtanh.f32 %v1006_v17 }
 0x94c   :  { %v3149_v23 = vpop.eup %3148 }
 0x94d   :  { %v3151_v24 = vpop.eup %3150  ;;  %v1010_v26 = vadd.f32 1.0, %v3149_v23 }
 0x94e   :  { %v3153_v27 = vpop.eup %3152  ;;  %v1115_v28 = vadd.f32 1.0, %v3151_v24 }
 0x94f   :  { %3160 = vrcp.f32 %v1010_v26  ;;  %v1116_v29 = vadd.f32 1.0, %v3153_v27  ;;  %v3155_v31 = vpop.eup %3154 }
 0x950   :  { %3162 = vrcp.f32 %v1115_v28  ;;  %v3157_v32 = vpop.eup %3156  ;;  %v1125_v36 = vrot.slane %v3155_v31, 3 }
 0x951   :  { %3164 = vrcp.f32 %v1116_v29  ;;  %v3159_v33 = vpop.eup %3158  ;;  %v1126_v38 = vrot.slane %v3157_v32, 2 }
 0x953   :  { %v1127_v53 = vsel %vm244_vm5, %v1126_v38, %v1125_v36 }
 0x95c   :  { %v3161_v34 = vpop.eup %3160 }
 0x95d   :  { %v3163_v35 = vpop.eup %3162  ;;  %v1014_v39 = vsel %vm3394_vm6, %v3159_v33, %v3161_v34 }
 0x95e   :  { %v3165_v50 = vpop.eup %3164  ;;  %1017 = vrot.lane.b32.xlu0 %v1014_v39, %s3332_s0  ;;  %v1131_v51 = vrot.slane %v3163_v35, 3  ;;  %v1015_v37 = vmul.f32 %v1014_v39, %v3547_v56 }
 0x95f   :  { %v1132_v52 = vrot.slane %v3165_v50, 2 }
 0x961   :  { %v1133_v54 = vsel %vm244_vm5, %v1132_v52, %v1131_v51 }
 0x962   :  { %v1135_v40 = vsel %vm3394_vm6, %v1127_v53, %v1133_v54 }
 0x963   :  { %1138 = vrot.lane.b32.xlu1 %v1135_v40, %s3332_s0  ;;  %v1136_v49 = vmul.f32 %v1135_v40, %v3551_v58 }
 0x9d0   :  { %v1018_v57 = vpop.permute.xlu0 %1017 }
 0x9d1   :  { %v1020_v59 = vmul.f32 %v1018_v57, %v1014_v39 }
 0x9d3   :  { %1022 = vrot.lane.b32.xlu0 %v1020_v59, %s3333_s19 }
 0x9d5   :  { %v1139_v60 = vpop.permute.xlu1 %1138 }
 0x9d6   :  { %v1141_v61 = vmul.f32 %v1139_v60, %v1135_v40 }
 0x9d8   :  { %1143 = vrot.lane.b32.xlu1 %v1141_v61, %s3333_s19 }
 0xa45   :  { %v1023_v62 = vpop.permute.xlu0 %1022 }
 0xa46   :  { %v3605_v63 = vadd.f32 %v1023_v62, %v1015_v37 }
 0xa48   :  { %3166 = vtanh.f32 %v3605_v63 }
 0xa4a   :  { %v1144_v2 = vpop.permute.xlu1 %1143 }
 0xa4b   :  { %v3609_v3 = vadd.f32 %v1144_v2, %v1136_v49 }
 0xa4d   :  { %3168 = vtanh.f32 %v3609_v3 }
 0xa55   :  { %v3167_v5 = vpop.eup %3166 }
 0xa56   :  { %1028 = vrot.lane.b32.xlu0 %v3167_v5, %s3332_s0 }
 0xa5a   :  { %v3169_v8 = vpop.eup %3168 }
 0xa5b   :  { %1149 = vrot.lane.b32.xlu1 %v3169_v8, %s3332_s0 }
 0xac8   :  { %v1029_v9 = vpop.permute.xlu0 %1028 }
 0xac9   :  { %v1031_v56 = vmul.f32 %v1029_v9, %v1014_v39 }
 0xacb   :  { %1154 = vrot.lane.b32.xlu0 %v1031_v56, %s3333_s19 }
 0xacd   :  { %v1150_v10 = vpop.permute.xlu1 %1149 }
 0xace   :  { %v1152_v13 = vmul.f32 %v1150_v10, %v1135_v40 }
 0xad0   :  { %1229 = vrot.lane.b32.xlu1 %v1152_v13, %s3333_s19 }
 0xb3d   :  { %v1155_v58 = vpop.permute.xlu0 %1154 }
 0xb3e   :  { %2926 = vmatmul.mubr.msk.f32.vlgmr.msra.gmra.mxu1 %vm147_vm7, %v1155_v58 }
 0xb3f   :  { %2940 = vmatpush3.msra.mxu1 %v3356_v1  ;;  %2947 = vmatprep.mubr.msk.f32.mxu1 %vm3331_vm0, %v3330_v0 }
 0xb40   :  { %2941 = vmatprep.subr.mxu1 %v3330_v0 }
 0xb41   :  { %2942 = vmatpush3.msra.mxu1 %v3362_v4 }
 0xb42   :  { %v1230_v14 = vpop.permute.xlu1 %1229  ;;  %2943 = vmatprep.subr.mxu1 %v3330_v0 }
 0xb43   :  { %2937 = vmatmul.mubr.msk.f32.vlgmr.msra.gmra.mxu0 %vm147_vm7, %v1230_v14  ;;  %2944 = vmatpush3.msra.mxu1 %v3368_v6 }
 0xb44   :  { %2945 = vmatprep.subr.mxu1 %v3330_v0  ;;  %2951 = vmatpush3.msra.mxu0 %v3407_v41 }
 0xb45   :  { %2946 = vmatpush3.msra.mxu1 %v3372_v7  ;;  %2952 = vmatprep.subr.mxu0 %v3330_v0 }
 0xb46   :  { %2948 = vmatmul.mubr.msk.f32.vlgmr.msra.gmra.mxu1 %vm147_vm7, %v1230_v14  ;;  %2953 = vmatpush3.msra.mxu0 %v3409_v42 }
 0xb47   :  { %2954 = vmatprep.subr.mxu0 %v3330_v0  ;;  %2958 = vmatprep.mubr.msk.f32.mxu0 %vm3331_vm0, %v3330_v0 }
 0xb48   :  { %2955 = vmatpush3.msra.mxu0 %v3417_v45  ;;  %2961 = vmatprep.subr.mxu1 %v3330_v0 }
 0xb49   :  { %2956 = vmatprep.subr.mxu0 %v3330_v0  ;;  %2962 = vmatpush3.msra.mxu1 %v3412_v43 }
 0xb4a   :  { %2957 = vmatpush3.msra.mxu0 %v3425_v47  ;;  %2963 = vmatprep.subr.mxu1 %v3330_v0 }
 0xb4b   :  { %2972 = vmatprep.subr.mxu0 %v3330_v0  ;;  %2964 = vmatpush3.msra.mxu1 %v3414_v44 }
 0xb4c   :  { %2965 = vmatprep.subr.mxu1 %v3330_v0  ;;  %2969 = vmatprep.mubr.msk.f32.mxu1 %vm3331_vm0, %v3330_v0 }
 0xb4d   :  { %2966 = vmatpush3.msra.mxu1 %v3422_v46 }
 0xb4e   :  { %2967 = vmatprep.subr.mxu1 %v3330_v0 }
 0xb4f   :  { %2968 = vmatpush3.msra.mxu1 %v3432_v48 }
 0xb50   :  { %2983 = vmatprep.subr.mxu1 %v3330_v0 }
 0xbfe   :  { %v1224_v15 = vpop.f32.mrf.mxu1 }
 0xc00   :  { %v2927_v16 = vpop.f32.mrf.mxu1 }
 0xc03   :  { %v1299_v17 = vpop.f32.mrf.mxu0 }
 0xc04   :  { %v1300_v18 = vadd.f32 %v1299_v17, %v1224_v15 }
 0xc05   :  { %v2938_v19 = vpop.f32.mrf.mxu0 }
 0xc06   :  { %v1303_v20 = vadd.f32 %v3474_v55, %v1300_v18  ;;  %v1395_v21 = vpop.f32.mrf.mxu1 }
 0xc07   :  { %v1400_v22 = vrot.slane %v1395_v21, 4  ;;  %v1401_v23 = vrot.slane %v1395_v21, 5 }
 0xc08   :  { %v2646_v24 = vmul.f32 -1.442695, %v1303_v20  ;;  %v2949_v26 = vpop.f32.mrf.mxu1 }
 0xc09   :  { %v1404_v27 = vadd.f32 %v1400_v22, %v3386_v12  ;;  %v1405_v28 = vadd.f32 %v1401_v23, %v3384_v11 }
 0xc0a   :  { %3170 = vpow2.f32 %v2646_v24 }
 0xc0b   :  { %v2648_v29 = vmul.f32 -1.442695, %v1404_v27  ;;  %v2649_v31 = vmul.f32 -1.442695, %v1405_v28 }
 0xc0d   :  { %3172 = vpow2.f32 %v2648_v29 }
 0xc0e   :  { %3174 = vpow2.f32 %v2649_v31 }
 0xc0f   :  { %3176 = vtanh.f32 %v1303_v20 }
 0xc10   :  { %3178 = vtanh.f32 %v1404_v27 }
 0xc11   :  { %3180 = vtanh.f32 %v1405_v28 }
 0xc17   :  { %v3171_v32 = vpop.eup %3170 }
 0xc18   :  { %v1307_v33 = vadd.f32 1.0, %v3171_v32 }
 0xc1a   :  { %v3173_v34 = vpop.eup %3172  ;;  %3182 = vrcp.f32 %v1307_v33 }
 0xc1b   :  { %v3175_v35 = vpop.eup %3174  ;;  %v1412_v36 = vadd.f32 1.0, %v3173_v34 }
 0xc1c   :  { %v1413_v38 = vadd.f32 1.0, %v3175_v35  ;;  %v3177_v39 = vpop.eup %3176 }
 0xc1d   :  { %3184 = vrcp.f32 %v1412_v36  ;;  %v3179_v50 = vpop.eup %3178 }
 0xc1e   :  { %3186 = vrcp.f32 %v1413_v38  ;;  %v3181_v51 = vpop.eup %3180  ;;  %v1422_v40 = vrot.slane %v3179_v50, 4 }
 0xc1f   :  { %v1423_v57 = vrot.slane %v3181_v51, 3 }
 0xc21   :  { %v1424_v37 = vsel %vm244_vm5, %v1423_v57, %v1422_v40 }
 0xc27   :  { %v3183_v52 = vpop.eup %3182 }
 0xc28   :  { %v1311_v53 = vsel %vm3394_vm6, %v3177_v39, %v3183_v52 }
 0xc29   :  { %1314 = vrot.lane.b32.xlu0 %v1311_v53, %s3332_s0  ;;  %v1312_v56 = vmul.f32 %v1311_v53, %v3605_v63 }
 0xc2a   :  { %v3185_v54 = vpop.eup %3184 }
 0xc2b   :  { %v3187_v59 = vpop.eup %3186  ;;  %v1428_v60 = vrot.slane %v3185_v54, 4 }
 0xc2c   :  { %v1429_v61 = vrot.slane %v3187_v59, 3 }
 0xc2e   :  { %v1430_v62 = vsel %vm244_vm5, %v1429_v61, %v1428_v60 }
 0xc2f   :  { %v1432_v49 = vsel %vm3394_vm6, %v1424_v37, %v1430_v62 }
 0xc30   :  { %1435 = vrot.lane.b32.xlu1 %v1432_v49, %s3332_s0  ;;  %v1433_v58 = vmul.f32 %v1432_v49, %v3609_v3 }
 0xc9b   :  { %v1315_v2 = vpop.permute.xlu0 %1314 }
 0xc9c   :  { %v1317_v5 = vmul.f32 %v1315_v2, %v1311_v53 }
 0xc9e   :  { %1319 = vrot.lane.b32.xlu0 %v1317_v5, %s3333_s19 }
 0xca2   :  { %v1436_v8 = vpop.permute.xlu1 %1435 }
 0xca3   :  { %v1438_v9 = vmul.f32 %v1436_v8, %v1432_v49 }
 0xca5   :  { %1440 = vrot.lane.b32.xlu1 %v1438_v9, %s3333_s19 }
 0xd10   :  { %v1320_v10 = vpop.permute.xlu0 %1319 }
 0xd11   :  { %v3663_v13 = vadd.f32 %v1320_v10, %v1312_v56 }
 0xd13   :  { %3188 = vtanh.f32 %v3663_v13 }
 0xd17   :  { %v1441_v14 = vpop.permute.xlu1 %1440 }
 0xd18   :  { %v3667_v15 = vadd.f32 %v1441_v14, %v1433_v58 }
 0xd1a   :  { %3190 = vtanh.f32 %v3667_v15 }
 0xd20   :  { %v3189_v16 = vpop.eup %3188 }
 0xd21   :  { %1325 = vrot.lane.b32.xlu0 %v3189_v16, %s3332_s0 }
 0xd27   :  { %v3191_v17 = vpop.eup %3190 }
 0xd28   :  { %1446 = vrot.lane.b32.xlu1 %v3191_v17, %s3332_s0 }
 0xd93   :  { %v1326_v18 = vpop.permute.xlu0 %1325 }
 0xd94   :  { %v1328_v63 = vmul.f32 %v1326_v18, %v1311_v53  ;;  %v3733_v18 = vld [vmem:[#allocation2 + $0x28] sm:$0xff] }
 0xd96   :  { %1451 = vrot.lane.b32.xlu0 %v1328_v63, %s3333_s19  ;;  %v3739_v63 = vld [vmem:[#allocation2 + $0x20] sm:$0xff] }
 0xd9a   :  { %v1447_v19 = vpop.permute.xlu1 %1446 }
 0xd9b   :  { %v1449_v20 = vmul.f32 %v1447_v19, %v1432_v49 }
 0xd9d   :  { %1526 = vrot.lane.b32.xlu1 %v1449_v20, %s3333_s19  ;;  %v3744_v20 = vld [vmem:[#allocation2 + $0x18] sm:$0xff] }
 0xe08   :  { %v1452_v3 = vpop.permute.xlu0 %1451 }
 0xe09   :  { %2959 = vmatmul.mubr.msk.f32.vlgmr.msra.gmra.mxu0 %vm147_vm7, %v1452_v3  ;;  %v3748_v3 = vld [vmem:[#allocation2 + $0x68] sm:$0xff] }
 0xe0a   :  { %2973 = vmatpush3.msra.mxu0 %v3356_v1  ;;  %2980 = vmatprep.mubr.msk.f32.mxu0 %vm3331_vm0, %v3330_v0 }
 0xe0b   :  { %2974 = vmatprep.subr.mxu0 %v3330_v0 }
 0xe0c   :  { %2975 = vmatpush3.msra.mxu0 %v3362_v4 }
 0xe0d   :  { %2976 = vmatprep.subr.mxu0 %v3330_v0 }
 0xe0e   :  { %2977 = vmatpush3.msra.mxu0 %v3368_v6 }
 0xe0f   :  { %2978 = vmatprep.subr.mxu0 %v3330_v0  ;;  %v1527_v21 = vpop.permute.xlu1 %1526 }
 0xe10   :  { %2979 = vmatpush3.msra.mxu0 %v3372_v7  ;;  %2970 = vmatmul.mubr.msk.f32.vlgmr.msra.gmra.mxu1 %vm147_vm7, %v1527_v21 }
 0xe11   :  { %2981 = vmatmul.mubr.msk.f32.vlgmr.msra.gmra.mxu0 %vm147_vm7, %v1527_v21  ;;  %2984 = vmatpush3.msra.mxu1 %v3407_v41  ;;  %v3751_v21 = vld [vmem:[#allocation2 + $0x10] sm:$0xff] }
 0xe12   :  { %2985 = vmatprep.subr.mxu1 %v3330_v0  ;;  %2994 = vmatprep.subr.mxu0 %v3330_v0 }
 0xe13   :  { %2986 = vmatpush3.msra.mxu1 %v3409_v42  ;;  %2995 = vmatpush3.msra.mxu0 %v3412_v43 }
 0xe14   :  { %2987 = vmatprep.subr.mxu1 %v3330_v0  ;;  %2996 = vmatprep.subr.mxu0 %v3330_v0 }
 0xe15   :  { %2988 = vmatpush3.msra.mxu1 %v3417_v45  ;;  %2997 = vmatpush3.msra.mxu0 %v3414_v44 }
 0xe16   :  { %2989 = vmatprep.subr.mxu1 %v3330_v0  ;;  %2991 = vmatprep.mubr.msk.f32.mxu1 %vm3331_vm0, %v3330_v0 }
 0xe17   :  { %2990 = vmatpush3.msra.mxu1 %v3425_v47  ;;  %2998 = vmatprep.subr.mxu0 %v3330_v0 }
 0xe18   :  { %3005 = vmatprep.subr.mxu1 %v3330_v0  ;;  %2999 = vmatpush3.msra.mxu0 %v3422_v46 }
 0xe19   :  { %3000 = vmatprep.subr.mxu0 %v3330_v0  ;;  %3002 = vmatprep.mubr.msk.f32.mxu0 %vm3331_vm0, %v3330_v0 }
 0xe1a   :  { %3001 = vmatpush3.msra.mxu0 %v3432_v48 }
 0xe1b   :  { %3016 = vmatprep.subr.mxu0 %v3330_v0 }
 0xec9   :  { %v1521_v1 = vpop.f32.mrf.mxu0 }
 0xecb   :  { %v2960_v4 = vpop.f32.mrf.mxu0 }
 0xecc   :  { %v3762_v4 = vld [vmem:[#allocation2 + $0x58] sm:$0xff] }
 0xed0   :  { %v1596_v6 = vpop.f32.mrf.mxu1 }
 0xed1   :  { %v1597_v7 = vadd.f32 %v1596_v6, %v1521_v1  ;;  %v1692_v41 = vpop.f32.mrf.mxu0  ;;  %v3756_v1 = vld [vmem:[#allocation2 + $0x60] sm:$0xff]  ;;  %v3767_v6 = vld [vmem:[#allocation2 + $0x48] sm:$0xff] }
 0xed2   :  { %v1697_v42 = vrot.slane %v1692_v41, 3  ;;  %v1698_v43 = vrot.slane %v1692_v41, 4  ;;  %v2971_v44 = vpop.f32.mrf.mxu1  ;;  %v3775_v41 = vld [vmem:[#allocation2 + $0x40] sm:$0xff] }
 0xed3   :  { %v1600_v45 = vadd.f32 %v3474_v55, %v1597_v7  ;;  %v2982_v46 = vpop.f32.mrf.mxu0  ;;  %v3770_v7 = vld [vmem:[#allocation2 + $0x50] sm:$0xff] }
 0xed4   :  { %v1701_v47 = vadd.f32 %v1697_v42, %v3386_v12  ;;  %v1702_v22 = vadd.f32 %v1698_v43, %v3384_v11  ;;  %v3781_v42 = vld [vmem:[#allocation2 + $0x38] sm:$0xff]  ;;  %v3785_v43 = vld [vmem:[#allocation2 + $0x30] sm:$0xff] }
 0xed5   :  { %v2652_v23 = vmul.f32 -1.442695, %v1600_v45 }
 0xed6   :  { %v2654_v24 = vmul.f32 -1.442695, %v1701_v47  ;;  %v2655_v48 = vmul.f32 -1.442695, %v1702_v22 }
 0xed7   :  { %3192 = vpow2.f32 %v2652_v23 }
 0xed8   :  { %3194 = vpow2.f32 %v2654_v24 }
 0xed9   :  { %3196 = vpow2.f32 %v2655_v48 }
 0xeda   :  { %3198 = vtanh.f32 %v1701_v47 }
 0xedb   :  { %3200 = vtanh.f32 %v1702_v22 }
 0xedc   :  { %3202 = vtanh.f32 %v1600_v45 }
 0xee4   :  { %v3193_v26 = vpop.eup %3192 }
 0xee5   :  { %v3195_v27 = vpop.eup %3194  ;;  %v1604_v28 = vadd.f32 1.0, %v3193_v26 }
 0xee6   :  { %v3197_v29 = vpop.eup %3196  ;;  %v1709_v31 = vadd.f32 1.0, %v3195_v27 }
 0xee7   :  { %3204 = vrcp.f32 %v1604_v28  ;;  %v1710_v32 = vadd.f32 1.0, %v3197_v29  ;;  %v3199_v33 = vpop.eup %3198 }
 0xee8   :  { %3206 = vrcp.f32 %v1709_v31  ;;  %v3201_v34 = vpop.eup %3200  ;;  %v1719_v39 = vrot.slane %v3199_v33, 5 }
 0xee9   :  { %3208 = vrcp.f32 %v1710_v32  ;;  %v3203_v35 = vpop.eup %3202  ;;  %v1720_v50 = vrot.slane %v3201_v34, 4 }
 0xeeb   :  { %v1721_v40 = vsel %vm244_vm5, %v1720_v50, %v1719_v39 }
 0xef4   :  { %v3205_v36 = vpop.eup %3204 }
 0xef5   :  { %v3207_v38 = vpop.eup %3206  ;;  %v1608_v51 = vsel %vm3394_vm6, %v3203_v35, %v3205_v36 }
 0xef6   :  { %v3209_v52 = vpop.eup %3208  ;;  %1611 = vrot.lane.b32.xlu0 %v1608_v51, %s3332_s0  ;;  %v1725_v53 = vrot.slane %v3207_v38, 5  ;;  %v1609_v49 = vmul.f32 %v1608_v51, %v3663_v13 }
 0xef7   :  { %v1726_v54 = vrot.slane %v3209_v52, 4 }
 0xef9   :  { %v1727_v57 = vsel %vm244_vm5, %v1726_v54, %v1725_v53 }
 0xefa   :  { %v1729_v59 = vsel %vm3394_vm6, %v1721_v40, %v1727_v57 }
 0xefb   :  { %1732 = vrot.lane.b32.xlu1 %v1729_v59, %s3332_s0  ;;  %v1730_v8 = vmul.f32 %v1729_v59, %v3667_v15 }
 0xf68   :  { %v1612_v60 = vpop.permute.xlu0 %1611 }
 0xf69   :  { %v1614_v61 = vmul.f32 %v1612_v60, %v1608_v51 }
 0xf6b   :  { %1616 = vrot.lane.b32.xlu0 %v1614_v61, %s3333_s19 }
 0xf6d   :  { %v1733_v37 = vpop.permute.xlu1 %1732 }
 0xf6e   :  { %v1735_v62 = vmul.f32 %v1733_v37, %v1729_v59 }
 0xf70   :  { %1737 = vrot.lane.b32.xlu1 %v1735_v62, %s3333_s19 }
 0xfdd   :  { %v1617_v2 = vpop.permute.xlu0 %1616 }
 0xfde   :  { %v3721_v5 = vadd.f32 %v1617_v2, %v1609_v49 }
 0xfe0   :  { %3210 = vtanh.f32 %v3721_v5 }
 0xfe2   :  { %v1738_v9 = vpop.permute.xlu1 %1737 }
 0xfe3   :  { %v3725_v56 = vadd.f32 %v1738_v9, %v1730_v8 }
 0xfe5   :  { %3212 = vtanh.f32 %v3725_v56 }
 0xfed   :  { %v3211_v10 = vpop.eup %3210 }
 0xfee   :  { %1622 = vrot.lane.b32.xlu0 %v3211_v10, %s3332_s0 }
 0xff2   :  { %v3213_v58 = vpop.eup %3212 }
 0xff3   :  { %1743 = vrot.lane.b32.xlu1 %v3213_v58, %s3332_s0 }
0x1060   :  { %v1623_v14 = vpop.permute.xlu0 %1622 }
0x1061   :  { %v1625_v13 = vmul.f32 %v1623_v14, %v1608_v51 }
0x1063   :  { %1748 = vrot.lane.b32.xlu0 %v1625_v13, %s3333_s19 }
0x1065   :  { %v1744_v16 = vpop.permute.xlu1 %1743 }
0x1066   :  { %v1746_v17 = vmul.f32 %v1744_v16, %v1729_v59 }
0x1068   :  { %1823 = vrot.lane.b32.xlu1 %v1746_v17, %s3333_s19 }
0x10d5   :  { %v1749_v15 = vpop.permute.xlu0 %1748 }
0x10d6   :  { %2992 = vmatmul.mubr.msk.f32.vlgmr.msra.gmra.mxu1 %vm147_vm7, %v1749_v15 }
0x10d7   :  { %3006 = vmatpush3.msra.mxu1 %v3733_v18  ;;  %3013 = vmatprep.mubr.msk.f32.mxu1 %vm3331_vm0, %v3330_v0 }
0x10d8   :  { %3007 = vmatprep.subr.mxu1 %v3330_v0 }
0x10d9   :  { %3008 = vmatpush3.msra.mxu1 %v3739_v63 }
0x10da   :  { %v1824_v19 = vpop.permute.xlu1 %1823  ;;  %3009 = vmatprep.subr.mxu1 %v3330_v0 }
0x10db   :  { %3003 = vmatmul.mubr.msk.f32.vlgmr.msra.gmra.mxu0 %vm147_vm7, %v1824_v19  ;;  %3010 = vmatpush3.msra.mxu1 %v3744_v20 }
0x10dc   :  { %3011 = vmatprep.subr.mxu1 %v3330_v0  ;;  %3017 = vmatpush3.msra.mxu0 %v3748_v3 }
0x10dd   :  { %3012 = vmatpush3.msra.mxu1 %v3751_v21  ;;  %3018 = vmatprep.subr.mxu0 %v3330_v0 }
0x10de   :  { %3014 = vmatmul.mubr.msk.f32.vlgmr.msra.gmra.mxu1 %vm147_vm7, %v1824_v19  ;;  %3019 = vmatpush3.msra.mxu0 %v3756_v1 }
0x10df   :  { %3020 = vmatprep.subr.mxu0 %v3330_v0  ;;  %3024 = vmatprep.mubr.msk.f32.mxu0 %vm3331_vm0, %v3330_v0 }
0x10e0   :  { %3021 = vmatpush3.msra.mxu0 %v3762_v4  ;;  %3027 = vmatprep.subr.mxu1 %v3330_v0 }
0x10e1   :  { %3022 = vmatprep.subr.mxu0 %v3330_v0  ;;  %3028 = vmatpush3.msra.mxu1 %v3767_v6 }
0x10e2   :  { %3023 = vmatpush3.msra.mxu0 %v3770_v7  ;;  %3029 = vmatprep.subr.mxu1 %v3330_v0 }
0x10e3   :  { %3038 = vmatprep.subr.mxu0 %v3330_v0  ;;  %3030 = vmatpush3.msra.mxu1 %v3775_v41 }
0x10e4   :  { %3031 = vmatprep.subr.mxu1 %v3330_v0  ;;  %3035 = vmatprep.mubr.msk.f32.mxu1 %vm3331_vm0, %v3330_v0 }
0x10e5   :  { %3032 = vmatpush3.msra.mxu1 %v3781_v42 }
0x10e6   :  { %3033 = vmatprep.subr.mxu1 %v3330_v0 }
0x10e7   :  { %3034 = vmatpush3.msra.mxu1 %v3785_v43 }
0x10e8   :  { %3049 = vmatprep.subr.mxu1 %v3330_v0 }
0x1196   :  { %v1818_v44 = vpop.f32.mrf.mxu1 }
0x1198   :  { %v2993_v45 = vpop.f32.mrf.mxu1 }
0x119b   :  { %v1893_v46 = vpop.f32.mrf.mxu0 }
0x119c   :  { %v1894_v47 = vadd.f32 %v1893_v46, %v1818_v44 }
0x119d   :  { %v3004_v22 = vpop.f32.mrf.mxu0 }
0x119e   :  { %v1897_v23 = vadd.f32 %v3474_v55, %v1894_v47  ;;  %v1989_v24 = vpop.f32.mrf.mxu1 }
0x119f   :  { %v1994_v48 = vrot.slane %v1989_v24, 2  ;;  %v1995_v26 = vrot.slane %v1989_v24, 3 }
0x11a0   :  { %v2658_v27 = vmul.f32 -1.442695, %v1897_v23  ;;  %v3015_v28 = vpop.f32.mrf.mxu1 }
0x11a1   :  { %v1998_v29 = vadd.f32 %v1994_v48, %v3386_v12  ;;  %v1999_v31 = vadd.f32 %v1995_v26, %v3384_v11 }
0x11a2   :  { %3214 = vpow2.f32 %v2658_v27 }
0x11a3   :  { %v2660_v32 = vmul.f32 -1.442695, %v1998_v29  ;;  %v2661_v33 = vmul.f32 -1.442695, %v1999_v31 }
0x11a5   :  { %3216 = vpow2.f32 %v2660_v32 }
0x11a6   :  { %3218 = vpow2.f32 %v2661_v33 }
0x11a7   :  { %3220 = vtanh.f32 %v1897_v23 }
0x11a8   :  { %3222 = vtanh.f32 %v1998_v29 }
0x11a9   :  { %3224 = vtanh.f32 %v1999_v31 }
0x11af   :  { %v3215_v34 = vpop.eup %3214 }
0x11b0   :  { %v1901_v35 = vadd.f32 1.0, %v3215_v34 }
0x11b2   :  { %v3217_v55 = vpop.eup %3216  ;;  %3226 = vrcp.f32 %v1901_v35 }
0x11b3   :  { %v3219_v36 = vpop.eup %3218  ;;  %v2006_v38 = vadd.f32 1.0, %v3217_v55 }
0x11b4   :  { %v2007_v39 = vadd.f32 1.0, %v3219_v36  ;;  %v3221_v50 = vpop.eup %3220 }
0x11b5   :  { %3228 = vrcp.f32 %v2006_v38  ;;  %v3223_v51 = vpop.eup %3222 }
0x11b6   :  { %3230 = vrcp.f32 %v2007_v39  ;;  %v3225_v52 = vpop.eup %3224  ;;  %v2016_v57 = vrot.slane %v3223_v51, 6 }
0x11b7   :  { %v2017_v59 = vrot.slane %v3225_v52, 5 }
0x11b9   :  { %v2018_v62 = vsel %vm244_vm5, %v2017_v59, %v2016_v57 }
0x11bf   :  { %v3227_v53 = vpop.eup %3226 }
0x11c0   :  { %v1905_v54 = vsel %vm3394_vm6, %v3221_v50, %v3227_v53 }
0x11c1   :  { %1908 = vrot.lane.b32.xlu0 %v1905_v54, %s3332_s0  ;;  %v1906_v14 = vmul.f32 %v1905_v54, %v3721_v5 }
0x11c2   :  { %v3229_v40 = vpop.eup %3228 }
0x11c3   :  { %v3231_v60 = vpop.eup %3230  ;;  %v2022_v61 = vrot.slane %v3229_v40, 6 }
0x11c4   :  { %v2023_v37 = vrot.slane %v3231_v60, 5 }
0x11c6   :  { %v2024_v49 = vsel %vm244_vm5, %v2023_v37, %v2022_v61 }
0x11c7   :  { %v2026_v2 = vsel %vm3394_vm6, %v2018_v62, %v2024_v49 }
0x11c8   :  { %2029 = vrot.lane.b32.xlu1 %v2026_v2, %s3332_s0  ;;  %v2027_v17 = vmul.f32 %v2026_v2, %v3725_v56 }
0x1233   :  { %v1909_v8 = vpop.permute.xlu0 %1908 }
0x1234   :  { %v1911_v9 = vmul.f32 %v1909_v8, %v1905_v54 }
0x1236   :  { %1913 = vrot.lane.b32.xlu0 %v1911_v9, %s3333_s19 }
0x123a   :  { %v2030_v10 = vpop.permute.xlu1 %2029 }
0x123b   :  { %v2032_v58 = vmul.f32 %v2030_v10, %v2026_v2 }
0x123d   :  { %2034 = vrot.lane.b32.xlu1 %v2032_v58, %s3333_s19 }
0x12a8   :  { %v1914_v13 = vpop.permute.xlu0 %1913 }
0x12a9   :  { %v3803_v16 = vadd.f32 %v1914_v13, %v1906_v14 }
0x12ab   :  { %3232 = vtanh.f32 %v3803_v16 }
0x12af   :  { %v2035_v15 = vpop.permute.xlu1 %2034 }
0x12b0   :  { %v3807_v19 = vadd.f32 %v2035_v15, %v2027_v17 }
0x12b2   :  { %3234 = vtanh.f32 %v3807_v19 }
0x12b8   :  { %v3233_v44 = vpop.eup %3232 }
0x12b9   :  { %1919 = vrot.lane.b32.xlu0 %v3233_v44, %s3332_s0 }
0x12bf   :  { %v3235_v45 = vpop.eup %3234 }
0x12c0   :  { %2040 = vrot.lane.b32.xlu1 %v3235_v45, %s3332_s0 }
0x132b   :  { %v1920_v46 = vpop.permute.xlu0 %1919 }
0x132c   :  { %v1922_v5 = vmul.f32 %v1920_v46, %v1905_v54 }
0x132e   :  { %2045 = vrot.lane.b32.xlu0 %v1922_v5, %s3333_s19 }
0x1332   :  { %v2041_v47 = vpop.permute.xlu1 %2040 }
0x1333   :  { %v2043_v22 = vmul.f32 %v2041_v47, %v2026_v2 }
0x1335   :  { %2120 = vrot.lane.b32.xlu1 %v2043_v22, %s3333_s19 }
0x13a0   :  { %v2046_v56 = vpop.permute.xlu0 %2045 }
0x13a1   :  { %3025 = vmatmul.mubr.msk.f32.vlgmr.msra.gmra.mxu0 %vm147_vm7, %v2046_v56 }
0x13a2   :  { %3039 = vmatpush3.msra.mxu0 %v3733_v18  ;;  %3046 = vmatprep.mubr.msk.f32.mxu0 %vm3331_vm0, %v3330_v0 }
0x13a3   :  { %3040 = vmatprep.subr.mxu0 %v3330_v0 }
0x13a4   :  { %3041 = vmatpush3.msra.mxu0 %v3739_v63 }
0x13a5   :  { %3042 = vmatprep.subr.mxu0 %v3330_v0 }
0x13a6   :  { %3043 = vmatpush3.msra.mxu0 %v3744_v20 }
0x13a7   :  { %3044 = vmatprep.subr.mxu0 %v3330_v0  ;;  %v2121_v23 = vpop.permute.xlu1 %2120 }
0x13a8   :  { %3045 = vmatpush3.msra.mxu0 %v3751_v21  ;;  %3036 = vmatmul.mubr.msk.f32.vlgmr.msra.gmra.mxu1 %vm147_vm7, %v2121_v23 }
0x13a9   :  { %3047 = vmatmul.mubr.msk.f32.vlgmr.msra.gmra.mxu0 %vm147_vm7, %v2121_v23  ;;  %3050 = vmatpush3.msra.mxu1 %v3748_v3 }
0x13aa   :  { %3051 = vmatprep.subr.mxu1 %v3330_v0  ;;  %3060 = vmatprep.subr.mxu0 %v3330_v0 }
0x13ab   :  { %3052 = vmatpush3.msra.mxu1 %v3756_v1  ;;  %3061 = vmatpush3.msra.mxu0 %v3767_v6 }
0x13ac   :  { %3053 = vmatprep.subr.mxu1 %v3330_v0  ;;  %3062 = vmatprep.subr.mxu0 %v3330_v0 }
0x13ad   :  { %3054 = vmatpush3.msra.mxu1 %v3762_v4  ;;  %3063 = vmatpush3.msra.mxu0 %v3775_v41 }
0x13ae   :  { %3055 = vmatprep.subr.mxu1 %v3330_v0  ;;  %3057 = vmatprep.mubr.msk.f32.mxu1 %vm3331_vm0, %v3330_v0 }
0x13af   :  { %3056 = vmatpush3.msra.mxu1 %v3770_v7  ;;  %3064 = vmatprep.subr.mxu0 %v3330_v0  ;;  %v3846_v7 = vld [vmem:[#allocation2 + $0x70] ss:$0 sm:$0xff] }
0x13b0   :  { %3065 = vmatpush3.msra.mxu0 %v3781_v42  ;;  %3068 = vmatprep.mubr.msk.f32.mxu0 %vm3331_vm0, %v3330_v0 }
0x13b1   :  { %3066 = vmatprep.subr.mxu0 %v3330_v0  ;;  %3071 = vmatprep.subr.mxu1 %v3330_v0 }
0x13b2   :  { %3067 = vmatpush3.msra.mxu0 %v3785_v43 }
0x1461   :  { %v2115_v18 = vpop.f32.mrf.mxu0 }
0x1463   :  { %v3026_v63 = vpop.f32.mrf.mxu0 }
0x1468   :  { %v2190_v20 = vpop.f32.mrf.mxu1 }
0x1469   :  { %v2191_v3 = vadd.f32 %v2190_v20, %v2115_v18  ;;  %v2286_v21 = vpop.f32.mrf.mxu0 }
0x146a   :  { %v2291_v1 = vrot.slane %v2286_v21, 1  ;;  %v2292_v4 = vrot.slane %v2286_v21, 2  ;;  %v3037_v6 = vpop.f32.mrf.mxu1 }
0x146b   :  { %v2194_v41 = vadd.f32 %v3846_v7, %v2191_v3  ;;  %v3048_v42 = vpop.f32.mrf.mxu0 }
0x146c   :  { %v2295_v24 = vadd.f32 %v2291_v1, %v3386_v12  ;;  %v2296_v48 = vadd.f32 %v2292_v4, %v3384_v11  ;;  %v48_v42 = vld [vmem:[#allocation2 + $0x90] sm:$0xff] }
0x146d   :  { %v2664_v26 = vmul.f32 -1.442695, %v2194_v41 }
0x146e   :  { %v2666_v27 = vmul.f32 -1.442695, %v2295_v24  ;;  %v2667_v43 = vmul.f32 -1.442695, %v2296_v48 }
0x146f   :  { %3236 = vpow2.f32 %v2664_v26 }
0x1470   :  { %3238 = vpow2.f32 %v2666_v27 }
0x1471   :  { %3240 = vpow2.f32 %v2667_v43 }
0x1472   :  { %3242 = vtanh.f32 %v2295_v24  ;;  %v47_v24 = vld [vmem:[#allocation2 + $0x88] sm:$0xff] }
0x1473   :  { %3244 = vtanh.f32 %v2296_v48  ;;  %v46_v48 = vld [vmem:[#allocation2 + $0x80] sm:$0xff] }
0x1474   :  { %3246 = vtanh.f32 %v2194_v41 }
0x147c   :  { %v3237_v28 = vpop.eup %3236 }
0x147d   :  { %v3239_v29 = vpop.eup %3238  ;;  %v2198_v31 = vadd.f32 1.0, %v3237_v28 }
0x147e   :  { %v3241_v32 = vpop.eup %3240  ;;  %v2303_v33 = vadd.f32 1.0, %v3239_v29  ;;  %v2671_v29 = vld [vmem:[#allocation2 + $0x98] ss:$0 sm:$0xff] }
0x147f   :  { %3248 = vrcp.f32 %v2198_v31  ;;  %v2304_v34 = vadd.f32 1.0, %v3241_v32  ;;  %v3243_v12 = vpop.eup %3242 }
0x1480   :  { %3250 = vrcp.f32 %v2303_v33  ;;  %v3245_v11 = vpop.eup %3244  ;;  %v2313_v38 = vrot.slane %v3243_v12, 7 }
0x1481   :  { %3252 = vrcp.f32 %v2304_v34  ;;  %v3247_v35 = vpop.eup %3246  ;;  %v2314_v39 = vrot.slane %v3245_v11, 6 }
0x1483   :  { %v2315_v54 = vsel %vm244_vm5, %v2314_v39, %v2313_v38 }
0x148c   :  { %v3249_v55 = vpop.eup %3248 }
0x148d   :  { %v3251_v36 = vpop.eup %3250  ;;  %v2202_v50 = vsel %vm3394_vm6, %v3247_v35, %v3249_v55 }
0x148e   :  { %v3253_v51 = vpop.eup %3252  ;;  %2205 = vrot.lane.b32.xlu0 %v2202_v50, %s3332_s0  ;;  %v2319_v52 = vrot.slane %v3251_v36, 7  ;;  %v2203_v62 = vmul.f32 %v2202_v50, %v3803_v16 }
0x148f   :  { %v2320_v53 = vrot.slane %v3253_v51, 6 }
0x1491   :  { %v2321_v40 = vsel %vm244_vm5, %v2320_v53, %v2319_v52 }
0x1492   :  { %v2323_v57 = vsel %vm3394_vm6, %v2315_v54, %v2321_v40 }
0x1493   :  { %2326 = vrot.lane.b32.xlu1 %v2323_v57, %s3332_s0  ;;  %v2324_v8 = vmul.f32 %v2323_v57, %v3807_v19 }
0x1500   :  { %v2206_v59 = vpop.permute.xlu0 %2205 }
0x1501   :  { %v2208_v60 = vmul.f32 %v2206_v59, %v2202_v50 }
0x1503   :  { %2210 = vrot.lane.b32.xlu0 %v2208_v60, %s3333_s19 }
0x1505   :  { %v2327_v61 = vpop.permute.xlu1 %2326 }
0x1506   :  { %v2329_v37 = vmul.f32 %v2327_v61, %v2323_v57 }
0x1508   :  { %2331 = vrot.lane.b32.xlu1 %v2329_v37, %s3333_s19 }
0x1575   :  { %v2211_v49 = vpop.permute.xlu0 %2210 }
0x1576   :  { %v2213_v2 = vadd.f32 %v2211_v49, %v2203_v62 }
0x1578   :  { %3254 = vtanh.f32 %v2213_v2 }
0x157a   :  { %v2332_v9 = vpop.permute.xlu1 %2331 }
0x157b   :  { %v2334_v10 = vadd.f32 %v2332_v9, %v2324_v8 }
0x157d   :  { %3256 = vtanh.f32 %v2334_v10 }
0x1585   :  { %v3255_v58 = vpop.eup %3254 }
0x1586   :  { %2216 = vrot.lane.b32.xlu0 %v3255_v58, %s3332_s0 }
0x158a   :  { %v3257_v14 = vpop.eup %3256 }
0x158b   :  { %2337 = vrot.lane.b32.xlu1 %v3257_v14, %s3332_s0 }
0x15f8   :  { %v2217_v13 = vpop.permute.xlu0 %2216 }
0x15f9   :  { %v2219_v17 = vmul.f32 %v2217_v13, %v2202_v50 }
0x15fb   :  { %2342 = vrot.lane.b32.xlu0 %v2219_v17, %s3333_s19 }
0x15fd   :  { %v2338_v15 = vpop.permute.xlu1 %2337 }
0x15fe   :  { %v2340_v16 = vmul.f32 %v2338_v15, %v2323_v57 }
0x1600   :  { %2417 = vrot.lane.b32.xlu1 %v2340_v16, %s3333_s19 }
0x166d   :  { %v2343_v44 = vpop.permute.xlu0 %2342 }
0x166e   :  { %3058 = vmatmul.mubr.msk.f32.vlgmr.msra.gmra.mxu1 %vm147_vm7, %v2343_v44 }
0x166f   :  { %3079 = vmatprep.mubr.msk.f32.mxu1 %vm3331_vm0, %v3330_v0  ;;  %3072 = vmatpush3.msra.mxu1 %v48_v42 }
0x1670   :  { %3073 = vmatprep.subr.mxu1 %v3330_v0 }
0x1671   :  { %3074 = vmatpush3.msra.mxu1 %v47_v24 }
0x1672   :  { %v2418_v19 = vpop.permute.xlu1 %2417  ;;  %3075 = vmatprep.subr.mxu1 %v3330_v0 }
0x1673   :  { %3069 = vmatmul.mubr.msk.f32.vlgmr.msra.gmra.mxu0 %vm147_vm7, %v2418_v19  ;;  %3076 = vmatpush3.msra.mxu1 %v46_v48 }
0x1674   :  { %3077 = vmatprep.subr.mxu1 %v3330_v0 }
0x1675   :  { %3078 = vmatpush3.msra.mxu1 %v45_v30 }
0x172e   :  { %v2412_v45 = vpop.f32.mrf.mxu1 }
0x1730   :  { %v3059_v46 = vpop.f32.mrf.mxu1 }
0x1733   :  { %v2487_v5 = vpop.f32.mrf.mxu0 }
0x1734   :  { %v2488_v47 = vadd.f32 %v2487_v5, %v2412_v45 }
0x1735   :  { %v3070_v22 = vpop.f32.mrf.mxu0 }
0x1736   :  { %v2491_v56 = vadd.f32 %v3846_v7, %v2488_v47 }
0x1738   :  { %v2670_v23 = vmul.f32 -1.442695, %v2491_v56 }
0x173a   :  { %3258 = vpow2.f32 %v2670_v23 }
0x173b   :  { %3260 = vtanh.f32 %v2491_v56 }
0x1747   :  { %v3259_v18 = vpop.eup %3258 }
0x1748   :  { %v2495_v63 = vadd.f32 1.0, %v3259_v18  ;;  %v3261_v20 = vpop.eup %3260 }
0x174a   :  { %3262 = vrcp.f32 %v2495_v63 }
0x1757   :  { %v3263_v3 = vpop.eup %3262 }
0x1758   :  { %v2499_v21 = vsel %vm3394_vm6, %v3261_v20, %v3263_v3 }
0x1759   :  { %2502 = vrot.lane.b32.xlu0 %v2499_v21, %s3332_s0  ;;  %v2500_v6 = vmul.f32 %v2499_v21, %v2213_v2 }
0x17cb   :  { %v2503_v1 = vpop.permute.xlu0 %2502 }
0x17cc   :  { %v2505_v4 = vmul.f32 %v2503_v1, %v2499_v21 }
0x17ce   :  { %2507 = vrot.lane.b32.xlu1 %v2505_v4, %s3333_s19 }
0x1840   :  { %v2508_v41 = vpop.permute.xlu1 %2507 }
0x1841   :  { %v2510_v7 = vadd.f32 %v2508_v41, %v2500_v6 }
0x1843   :  { %3264 = vtanh.f32 %v2510_v7 }
0x1850   :  { %v3265_v26 = vpop.eup %3264 }
0x1851   :  { %2513 = vrot.lane.b32.xlu0 %v3265_v26, %s3332_s0 }
0x18c3   :  { %v2514_v27 = vpop.permute.xlu0 %2513 }
0x18c4   :  { %v2516_v43 = vmul.f32 %v2514_v27, %v2499_v21 }
0x18c6   :  { %2522 = vrot.lane.b32.xlu1 %v2516_v43, %s3333_s19 }
0x1938   :  { %v2523_v28 = vpop.permute.xlu1 %2522 }
0x1939   :  { %3080 = vmatmul.mubr.msk.f32.vlgmr.msra.gmra.mxu1 %vm147_vm7, %v2523_v28 }
0x19f9   :  { %v2592_v31 = vpop.f32.mrf.mxu1 }
0x19fa   :  { %v2593_v32 = vadd.f32 %v2671_v29, %v2592_v31 }
0x19fb   :  { %v3081_v33 = vpop.f32.mrf.mxu1 }
0x19fc   :  { %v2673_v34 = vmul.f32 -1.442695, %v2593_v32 }
0x19fe   :  { %3266 = vpow2.f32 %v2673_v34 }
0x1a0b   :  { %v3267_v12 = vpop.eup %3266 }
0x1a0c   :  { %v2600_v11 = vadd.f32 1.0, %v3267_v12 }
0x1a0e   :  { %3268 = vrcp.f32 %v2600_v11 }
0x1a1b   :  { %v3269_v0 = vpop.eup %3268 }
0x1a1c   :  { %v2603_v35 = vsel %vm2596_vm8, %v3269_v0, %v2593_v32 }
0x1a1d   :  { %2604 = vst [vmem:[#allocation5] sm:$0x3] %v2603_v35 }
0x1a1e   :  { %3314 = shalt.err (!%p3311_p9)
}
0x1a1f   :  { %2614 = dma.vmem_to_hbm [thread:$0]  %s2612_s21, 32, %s3888_s2, [#allocation4]  }
0x1a20   :  { %3325 = dma.done.wait [#allocation4], 32  }
0x1a21   :  { %3326 = vsyncadd [#allocation4], 4294967264 }
0x1a22   :  { %2618 = vsyncpa [#allocation3], 1 }
0x1a23   :  { %2619 = vsyncpa [#allocation4], 1 }

</bundles_post_ra>
